<compile_context>
chip_gen: v5e
topology: v5e:2x2
jax: 0.10.0
libtpu: 0.0.40
codegen_flags: <defaults>
</compile_context>

<pallas_src>
import jax
import jax.numpy as jnp
from jax.experimental import pallas as pl
from jax.experimental.pallas import tpu as pltpu


# ----------------------------- kernel ----------------------------------------


def _make_fused_kernel(wd, tile_rows, n_t, cpg, hw, use_mxu_stats):
    n = wd * tile_rows            # output pixels per row tile (w-major order)
    npix = float(hw)              # pixels per channel
    cnt = float(hw * cpg)         # elements per (sample, group)
    aligned = (n % 8 == 0)

    def kernel(xs_ref, w_ref, par_ref, gmask_ref, o_ref, st_acc):
        # xs_ref   : (1, W+2, TH, 3*Cin) bf16  kh-packed, channels-last, W-major
        # w_ref    : (3, 3*Cin, CoutP)   bf16  weight-standardized, kw-indexed
        # par_ref  : (1, 8, CoutP)       f32   rows [gamma, beta, bias, scale+1, shift, 0,0,0]
        # gmask_ref: (CoutP, CoutP)      f32   block-diagonal same-group mask
        # o_ref    : (1, HW, CoutP)      bf16  VMEM-resident per-sample output block
        # st_acc   : (2, CoutP)          f32   per-channel [sum, sumsq] of conv-only y
        t = pl.program_id(1)
        wp2 = xs_ref.shape[1]
        th = xs_ref.shape[2]
        k3 = xs_ref.shape[3]

        # ---- 3x3 conv as 3 MXU matmuls with K = 3*Cin (kh packed into K) ----
        xm = xs_ref[0].reshape(wp2 * th, k3)                  # bf16, aligned reshape
        acc = None
        for dw in range(3):
            xt = xm[dw * th:(dw + wd) * th]                   # (n, 3*Cin), aligned slice
            d = jnp.dot(xt, w_ref[dw], preferred_element_type=jnp.float32)
            acc = d if acc is None else acc + d               # (n, CoutP) f32, NO bias

        # ---- per-channel sum / sumsq for GroupNorm ---------------------------
        if use_mxu_stats:
            ones = jnp.ones((1, n), jnp.float32)
            s1 = jnp.dot(ones, acc, preferred_element_type=jnp.float32)
            s2 = jnp.dot(ones, acc * acc, preferred_element_type=jnp.float32)
        else:
            s1 = jnp.sum(acc, axis=0, keepdims=True)
            s2 = jnp.sum(acc * acc, axis=0, keepdims=True)
        part = jnp.concatenate([s1, s2], axis=0)              # (2, CoutP)

        @pl.when(t == 0)
        def _():
            st_acc[...] = part

        @pl.when(t != 0)
        def _():
            st_acc[...] = st_acc[...] + part

        # ---- park conv rows in the VMEM-resident output block ----------------
        row0 = t * n
        if aligned:
            row0 = pl.multiple_of(row0, 8)
        o_ref[0, pl.ds(row0, n), :] = acc.astype(o_ref.dtype)

        # ---- last row tile: GroupNorm + scale/shift + SiLU, in place ---------
        @pl.when(t == n_t - 1)
        def _():
            gamma = par_ref[0, 0:1, :]
            beta = par_ref[0, 1:2, :]
            bias = par_ref[0, 2:3, :]
            sc = par_ref[0, 3:4, :]           # scale + 1 (ones if no scale_shift)
            sh = par_ref[0, 4:5, :]           # shift     (zeros if no scale_shift)

            # stats of y = conv + bias from conv-only sums (bias folded analytically)
            s1c = st_acc[0:1, :]
            s2c = st_acc[1:2, :]
            s1b = s1c + npix * bias
            s2b = s2c + 2.0 * bias * s1c + npix * bias * bias
            stb = jnp.concatenate([s1b, s2b], axis=0)         # (2, CoutP)
            # per-channel copy of its group's totals via block-diagonal mask matmul
            gs = jnp.dot(stb, gmask_ref[...], preferred_element_type=jnp.float32)
            mean = gs[0:1, :] * (1.0 / cnt)
            # one-pass (biased) variance; f32 sums over hw*cpg elements are adequate here
            var = gs[1:2, :] * (1.0 / cnt) - mean * mean
            inv = jax.lax.rsqrt(var + 1e-5)
            gi = gamma * inv
            a_row = gi * sc                                   # fused per-channel scale
            b_row = (gi * (bias - mean) + beta) * sc + sh     # fused offset (incl. conv bias)

            @pl.loop(0, n_t)                                  # chunked: bounds f32 temporaries
            def _(tt):
                r0 = tt * n
                if aligned:
                    r0 = pl.multiple_of(r0, 8)
                y = o_ref[0, pl.ds(r0, n), :].astype(jnp.float32)
                z = y * a_row + b_row
                o_ref[0, pl.ds(r0, n), :] = (z * jax.nn.sigmoid(z)).astype(o_ref.dtype)

    return kernel


# ----------------------------- host-side glue ---------------------------------


def weight_standardize(w, eps=1e-5):
    # w: (Cout, Cin, 3, 3) OIHW; mean/var over (Cin, kh, kw), biased variance.
    mean = jnp.mean(w, axis=(1, 2, 3), keepdims=True)
    var = jnp.mean((w - mean) ** 2, axis=(1, 2, 3), keepdims=True)
    return (w - mean) * jax.lax.rsqrt(var + eps)


def _round_up(x, m):
    return (x + m - 1) // m * m


def _vmem_limit_bytes():
    # Budget against the current generation's physical VMEM, with headroom.
    try:
        cap = pltpu.get_tpu_info().vmem_capacity_bytes
    except Exception:
        cap = 64 * 1024 * 1024
    return int(min(max(cap - 16 * 1024 * 1024, 32 * 1024 * 1024),
                   100 * 1024 * 1024))


def block_forward(x, params, scale_shift=None, groups=8, max_tile_rows=None):
    """x: (B, Cin, H, W) float32 NCHW (PyTorch convention). Returns (B, Cout, H, W) f32."""
    w, bias = params["w"], params["b"]
    gamma, beta = params["gamma"], params["beta"]
    b, cin, h, wd = x.shape
    cout = w.shape[0]
    assert cout % groups == 0, "GroupNorm requires cout % groups == 0"
    cpg = cout // groups
    coutp = _round_up(cout, 128)            # lane-dense channel dim
    hw = h * wd
    cin3 = 3 * cin

    # ---- VMEM budget / row-tile size ----------------------------------------
    vmem_limit = _vmem_limit_bytes()
    fixed = (2 * hw * coutp * 2             # resident out block, dbuf bf16
             + 2 * 9 * cin * coutp * 2      # packed weights, dbuf bf16
             + 2 * coutp * coutp * 4        # group mask, dbuf f32
             + 2 * 8 * coutp * 4            # params, dbuf f32
             + 2 * coutp * 4)               # stats scratch
    budget = vmem_limit - 4 * 1024 * 1024
    # TODO(synk): two-pass (y spilled to HBM) fallback for feature maps whose
    # per-sample activation does not fit in VMEM.
    assert fixed < budget, "per-sample activation too large for the fused VMEM-resident kernel"

    cands = [th for th in range(h, 0, -1)
             if h % th == 0 and (th % 8 == 0 or th == h)]
    if max_tile_rows is not None:
        cands = [th for th in cands if th <= max_tile_rows] or cands[-1:]
    tile_rows = cands[-1]
    for th in cands:
        per = (2 * (wd + 2) * th * cin3 * 2     # xs block, dbuf bf16
               + 4 * (wd * th) * coutp * 4)     # f32 acc / temporaries
        if fixed + per <= budget:
            tile_rows = th
            break
    n_t = h // tile_rows

    # ---- weight standardization + kh tap packing (K = 3*Cin) -----------------
    # TODO(synk): PyTorch uses eps=1e-3 for non-f32 inputs; only the f32 path is handled.
    w_std = weight_standardize(w.astype(jnp.float32), eps=1e-5)       # (Cout,Cin,3,3)
    w_k = jnp.transpose(w_std, (3, 2, 1, 0)).reshape(3, cin3, cout)   # (kw, kh*Cin, Cout)
    w_k = jnp.pad(w_k, ((0, 0), (0, 0), (0, coutp - cout))).astype(jnp.bfloat16)

    # ---- per-channel parameter rows: [gamma, beta, bias, scale+1, shift] -----
    if scale_shift is not None:
        scale, shift = scale_shift
        sc = scale.reshape(b, cout).astype(jnp.float32) + 1.0
        sh = shift.reshape(b, cout).astype(jnp.float32)
    else:
        sc = jnp.ones((b, cout), jnp.float32)
        sh = jnp.zeros((b, cout), jnp.float32)
    g_b = jnp.broadcast_to(gamma.astype(jnp.float32)[None, :], (b, cout))
    be_b = jnp.broadcast_to(beta.astype(jnp.float32)[None, :], (b, cout))
    bi_b = jnp.broadcast_to(bias.astype(jnp.float32)[None, :], (b, cout))
    par = jnp.stack([g_b, be_b, bi_b, sc, sh], axis=1)                # (B,5,Cout)
    par = jnp.pad(par, ((0, 0), (0, 3), (0, coutp - cout)))           # (B,8,CoutP)

    # ---- same-group mask: one tiny matmul turns per-channel sums into group totals
    gid = jnp.concatenate([jnp.arange(cout, dtype=jnp.int32) // cpg,
                           jnp.full((coutp - cout,), groups, jnp.int32)])
    gmask = (gid[:, None] == gid[None, :]).astype(jnp.float32)        # (CoutP,CoutP)

    # ---- channels-last, W-major input; the 3 kh taps packed into channels ----
    # xs[b, wcol, h, kh*Cin + c] = x_padded[b, h+kh, wcol, c]
    x_cl = jnp.transpose(x, (0, 2, 3, 1)).astype(jnp.bfloat16)        # (B,H,W,Cin)
    x_p = jnp.pad(x_cl, ((0, 0), (1, 1), (1, 1), (0, 0)))             # (B,H+2,W+2,Cin)
    xs = jnp.concatenate([x_p[:, dh:dh + h, :, :] for dh in range(3)], axis=-1)
    xs = jnp.transpose(xs, (0, 2, 1, 3))                              # (B,W+2,H,3Cin)

    use_mxu_stats = cin3 <= 64            # small-K regime: VPU is the scarce unit
    kernel = _make_fused_kernel(wd, tile_rows, n_t, cpg, hw, use_mxu_stats)

    out = pl.pallas_call(
        kernel,
        out_shape=jax.ShapeDtypeStruct((b, hw, coutp), jnp.bfloat16),
        grid_spec=pltpu.PrefetchScalarGridSpec(
            num_scalar_prefetch=0,
            grid=(b, n_t),
            in_specs=[
                pl.BlockSpec((1, wd + 2, tile_rows, cin3), lambda i, t: (i, 0, t, 0)),
                pl.BlockSpec((3, cin3, coutp), lambda i, t: (0, 0, 0)),
                pl.BlockSpec((1, 8, coutp), lambda i, t: (i, 0, 0)),
                pl.BlockSpec((coutp, coutp), lambda i, t: (0, 0)),
            ],
            out_specs=pl.BlockSpec((1, hw, coutp), lambda i, t: (i, 0, 0)),
            scratch_shapes=[pltpu.VMEM((2, coutp), jnp.float32)],
        ),
        compiler_params=pltpu.CompilerParams(
            dimension_semantics=("parallel", "arbitrary"),
            vmem_limit_bytes=vmem_limit),
    )(xs, w_k, par, gmask)

    # ---- undo (tile, w, h_local) pixel ordering; back to NCHW float32 --------
    o5 = out[:, :, :cout].astype(jnp.float32).reshape(b, n_t, wd, tile_rows, cout)
    return jnp.transpose(o5, (0, 4, 1, 3, 2)).reshape(b, cout, h, wd)


# ----------------------------- reference & test -------------------------------


def reference_block(x, params, scale_shift, groups=8):
    # pure-JAX f32 reference mirroring the PyTorch module (validation only)
    w = weight_standardize(params["w"].astype(jnp.float32), eps=1e-5)
    y = jax.lax.conv_general_dilated(
        x.astype(jnp.float32), w, window_strides=(1, 1), padding=((1, 1), (1, 1)),
        dimension_numbers=("NCHW", "OIHW", "NCHW"),
        precision=jax.lax.Precision.HIGHEST)
    y = y + params["b"][None, :, None, None]
    b, c, h, wd = y.shape
    yg = y.reshape(b, groups, c // groups, h, wd)
    m = jnp.mean(yg, axis=(2, 3, 4), keepdims=True)
    v = jnp.mean((yg - m) ** 2, axis=(2, 3, 4), keepdims=True)
    yn = ((yg - m) * jax.lax.rsqrt(v + 1e-5)).reshape(b, c, h, wd)
    yn = yn * params["gamma"][None, :, None, None] + params["beta"][None, :, None, None]
    if scale_shift is not None:
        s, sh = scale_shift
        yn = yn * (s[:, :, None, None] + 1.0) + sh[:, :, None, None]
    return yn * jax.nn.sigmoid(yn)


if __name__ == "__main__":
    key = jax.random.PRNGKey(0)
    B, Cin, Cout, H, W, G = 2, 4, 16, 16, 16, 8
    k1, k2, k3, k4, k5, k6, k7 = jax.random.split(key, 7)

    x = jax.random.normal(k1, (B, Cin, H, W), jnp.float32)
    params = dict(
        w=0.1 * jax.random.normal(k2, (Cout, Cin, 3, 3), jnp.float32),
        b=0.1 * jax.random.normal(k3, (Cout,), jnp.float32),
        gamma=1.0 + 0.1 * jax.random.normal(k4, (Cout,), jnp.float32),
        beta=0.1 * jax.random.normal(k5, (Cout,), jnp.float32),
    )
    scale = 0.1 * jax.random.normal(k6, (B, Cout), jnp.float32)
    shift = 0.1 * jax.random.normal(k7, (B, Cout), jnp.float32)

    fwd = jax.jit(lambda xx, pp, ss: block_forward(xx, pp, scale_shift=ss, groups=G))
    fwd_plain = jax.jit(lambda xx, pp: block_forward(xx, pp, scale_shift=None, groups=G))
    # force 2 row tiles to also exercise the multi-tile accumulation path
    fwd_tiled = jax.jit(lambda xx, pp, ss: block_forward(
        xx, pp, scale_shift=ss, groups=G, max_tile_rows=8))

    out = jax.block_until_ready(fwd(x, params, (scale, shift)))
    assert out.shape == (B, Cout, H, W)
    ref = reference_block(x, params, (scale, shift), groups=G)
    err = float(jnp.max(jnp.abs(out - ref)))
    # bf16 MXU operands + bf16 resident activation => relax the f32 tolerance
    assert err < 0.15, f"max abs err (scale_shift) = {err}"

    out2 = jax.block_until_ready(fwd_plain(x, params))
    ref2 = reference_block(x, params, None, groups=G)
    err2 = float(jnp.max(jnp.abs(out2 - ref2)))
    assert err2 < 0.15, f"max abs err (no scale_shift) = {err2}"

    out3 = jax.block_until_ready(fwd_tiled(x, params, (scale, shift)))
    err3 = float(jnp.max(jnp.abs(out3 - ref)))
    assert err3 < 0.15, f"max abs err (2 row tiles) = {err3}"

    print("KERNEL_OK")
</pallas_src>

<mosaic_0001>
module attributes {stable_mosaic.version = 11 : i64} {
  func.func @kernel(%arg0: i32, %arg1: i32, %arg2: memref<1x18x16x12xbf16, #tpu.memory_space<vmem>>, %arg3: memref<3x12x128xbf16, #tpu.memory_space<vmem>>, %arg4: memref<1x8x128xf32, #tpu.memory_space<vmem>>, %arg5: memref<128x128xf32, #tpu.memory_space<vmem>>, %arg6: memref<1x256x128xbf16, #tpu.memory_space<vmem>>, %arg7: memref<2x128xf32, #tpu.memory_space<vmem>>) attributes {dimension_semantics = [#tpu.dimension_semantics<parallel>, #tpu.dimension_semantics<arbitrary>], iteration_bounds = array<i64: 2, 1>, scalar_prefetch = 0 : i64, scratch_operands = 1 : i64, tpu.core_type = #tpu.core_type<tc>, window_params = [{transform_indices = @transform_0, window_bounds = array<i64: 1, 18, 16, 12>}, {pipeline_mode = #tpu.pipeline_mode<synchronous>, transform_indices = @transform_1, window_bounds = array<i64: 3, 12, 128>}, {transform_indices = @transform_2, window_bounds = array<i64: 1, 8, 128>}, {pipeline_mode = #tpu.pipeline_mode<synchronous>, transform_indices = @transform_3, window_bounds = array<i64: 128, 128>}, {transform_indices = @transform_4, window_bounds = array<i64: 1, 256, 128>}]} {
    %c0 = arith.constant 0 : index
    %c0_0 = arith.constant 0 : index
    %c0_1 = arith.constant 0 : index
    %c0_2 = arith.constant 0 : index
    %0 = vector.load %arg2[%c0, %c0_0, %c0_1, %c0_2] : memref<1x18x16x12xbf16, #tpu.memory_space<vmem>>, vector<1x18x16x12xbf16>
    %1 = vector.shape_cast %0 : vector<1x18x16x12xbf16> to vector<18x16x12xbf16>
    %2 = vector.shape_cast %1 : vector<18x16x12xbf16> to vector<288x12xbf16>
    %3 = vector.extract_strided_slice %2 {offsets = [0, 0], sizes = [256, 12], strides = [1, 1]} : vector<288x12xbf16> to vector<256x12xbf16>
    %c0_3 = arith.constant 0 : index
    %c0_4 = arith.constant 0 : index
    %c0_5 = arith.constant 0 : index
    %4 = vector.load %arg3[%c0_3, %c0_4, %c0_5] : memref<3x12x128xbf16, #tpu.memory_space<vmem>>, vector<1x12x128xbf16>
    %5 = vector.shape_cast %4 : vector<1x12x128xbf16> to vector<12x128xbf16>
    %cst = arith.constant dense<0.000000e+00> : vector<256x128xf32>
    %6 = tpu.matmul %3, %5, %cst {dimension_numbers = #tpu.dot_dimension_numbers<[1], [0], [0], [1], [0, 0, 1, 1], [], []>} : vector<256x12xbf16>, vector<12x128xbf16>, vector<256x128xf32> -> vector<256x128xf32>
    %7 = vector.extract_strided_slice %2 {offsets = [16, 0], sizes = [256, 12], strides = [1, 1]} : vector<288x12xbf16> to vector<256x12xbf16>
    %c1 = arith.constant 1 : index
    %c0_6 = arith.constant 0 : index
    %c0_7 = arith.constant 0 : index
    %8 = vector.load %arg3[%c1, %c0_6, %c0_7] : memref<3x12x128xbf16, #tpu.memory_space<vmem>>, vector<1x12x128xbf16>
    %9 = vector.shape_cast %8 : vector<1x12x128xbf16> to vector<12x128xbf16>
    %cst_8 = arith.constant dense<0.000000e+00> : vector<256x128xf32>
    %10 = tpu.matmul %7, %9, %cst_8 {dimension_numbers = #tpu.dot_dimension_numbers<[1], [0], [0], [1], [0, 0, 1, 1], [], []>} : vector<256x12xbf16>, vector<12x128xbf16>, vector<256x128xf32> -> vector<256x128xf32>
    %11 = arith.addf %6, %10 : vector<256x128xf32>
    %12 = vector.extract_strided_slice %2 {offsets = [32, 0], sizes = [256, 12], strides = [1, 1]} : vector<288x12xbf16> to vector<256x12xbf16>
    %c2 = arith.constant 2 : index
    %c0_9 = arith.constant 0 : index
    %c0_10 = arith.constant 0 : index
    %13 = vector.load %arg3[%c2, %c0_9, %c0_10] : memref<3x12x128xbf16, #tpu.memory_space<vmem>>, vector<1x12x128xbf16>
    %14 = vector.shape_cast %13 : vector<1x12x128xbf16> to vector<12x128xbf16>
    %cst_11 = arith.constant dense<0.000000e+00> : vector<256x128xf32>
    %15 = tpu.matmul %12, %14, %cst_11 {dimension_numbers = #tpu.dot_dimension_numbers<[1], [0], [0], [1], [0, 0, 1, 1], [], []>} : vector<256x12xbf16>, vector<12x128xbf16>, vector<256x128xf32> -> vector<256x128xf32>
    %16 = arith.addf %11, %15 : vector<256x128xf32>
    %cst_12 = arith.constant 1.000000e+00 : f32
    %17 = vector.broadcast %cst_12 : f32 to vector<1x256xf32>
    %cst_13 = arith.constant dense<0.000000e+00> : vector<1x128xf32>
    %18 = tpu.matmul %17, %16, %cst_13 {dimension_numbers = #tpu.dot_dimension_numbers<[1], [0], [0], [1], [0, 0, 1, 1], [], []>} : vector<1x256xf32>, vector<256x128xf32>, vector<1x128xf32> -> vector<1x128xf32>
    %19 = arith.mulf %16, %16 : vector<256x128xf32>
    %cst_14 = arith.constant dense<0.000000e+00> : vector<1x128xf32>
    %20 = tpu.matmul %17, %19, %cst_14 {dimension_numbers = #tpu.dot_dimension_numbers<[1], [0], [0], [1], [0, 0, 1, 1], [], []>} : vector<1x256xf32>, vector<256x128xf32>, vector<1x128xf32> -> vector<1x128xf32>
    %21 = tpu.concatenate %18, %20 in 0 : vector<1x128xf32>, vector<1x128xf32> -> vector<2x128xf32>
    %c0_i32 = arith.constant 0 : i32
    %22 = arith.cmpi eq, %arg1, %c0_i32 : i32
    %23 = arith.extui %22 : i1 to i32
    %c0_i32_15 = arith.constant 0 : i32
    %24 = arith.cmpi ne, %23, %c0_i32_15 : i32
    scf.if %24 {
      %c0_22 = arith.constant 0 : index
      %c0_23 = arith.constant 0 : index
      %38 = vector.load %arg7[%c0_22, %c0_23] : memref<2x128xf32, #tpu.memory_space<vmem>>, vector<2x128xf32>
      tpu.vector_store %arg7[%c0_22, %c0_23], %21 {strides = array<i32>} : memref<2x128xf32, #tpu.memory_space<vmem>>, vector<2x128xf32>,
    } else {
    }
    %c0_i32_16 = arith.constant 0 : i32
    %25 = arith.cmpi ne, %arg1, %c0_i32_16 : i32
    %26 = arith.extui %25 : i1 to i32
    %c0_i32_17 = arith.constant 0 : i32
    %27 = arith.cmpi ne, %26, %c0_i32_17 : i32
    scf.if %27 {
      %c0_22 = arith.constant 0 : index
      %c0_23 = arith.constant 0 : index
      %38 = vector.load %arg7[%c0_22, %c0_23] : memref<2x128xf32, #tpu.memory_space<vmem>>, vector<2x128xf32>
      %39 = arith.addf %38, %21 : vector<2x128xf32>
      %c0_24 = arith.constant 0 : index
      %c0_25 = arith.constant 0 : index
      %40 = vector.load %arg7[%c0_24, %c0_25] : memref<2x128xf32, #tpu.memory_space<vmem>>, vector<2x128xf32>
      tpu.vector_store %arg7[%c0_24, %c0_25], %39 {strides = array<i32>} : memref<2x128xf32, #tpu.memory_space<vmem>>, vector<2x128xf32>,
    } else {
    }
    %c256_i32 = arith.constant 256 : i32
    %28 = arith.muli %arg1, %c256_i32 : i32
    %29 = tpu.assume_multiple %28, 8 : i32
    %30 = arith.truncf %16 : vector<256x128xf32> to vector<256x128xbf16>
    %c0_18 = arith.constant 0 : index
    %31 = arith.index_cast %29 : i32 to index
    %c0_19 = arith.constant 0 : index
    %32 = vector.load %arg6[%c0_18, %31, %c0_19] : memref<1x256x128xbf16, #tpu.memory_space<vmem>>, vector<1x256x128xbf16>
    %33 = vector.shape_cast %32 : vector<1x256x128xbf16> to vector<256x128xbf16>
    %34 = vector.shape_cast %30 : vector<256x128xbf16> to vector<1x256x128xbf16>
    tpu.vector_store %arg6[%c0_18, %31, %c0_19], %34 {strides = array<i32>} : memref<1x256x128xbf16, #tpu.memory_space<vmem>>, vector<1x256x128xbf16>,
    %c0_i32_20 = arith.constant 0 : i32
    %35 = arith.cmpi eq, %arg1, %c0_i32_20 : i32
    %36 = arith.extui %35 : i1 to i32
    %c0_i32_21 = arith.constant 0 : i32
    %37 = arith.cmpi ne, %36, %c0_i32_21 : i32
    scf.if %37 {
      %c0_22 = arith.constant 0 : index
      %c0_23 = arith.constant 0 : index
      %c0_24 = arith.constant 0 : index
      %38 = vector.load %arg4[%c0_22, %c0_23, %c0_24] : memref<1x8x128xf32, #tpu.memory_space<vmem>>, vector<1x1x128xf32>
      %39 = vector.shape_cast %38 : vector<1x1x128xf32> to vector<1x128xf32>
      %c0_25 = arith.constant 0 : index
      %c1_26 = arith.constant 1 : index
      %c0_27 = arith.constant 0 : index
      %40 = vector.load %arg4[%c0_25, %c1_26, %c0_27] : memref<1x8x128xf32, #tpu.memory_space<vmem>>, vector<1x1x128xf32>
      %41 = vector.shape_cast %40 : vector<1x1x128xf32> to vector<1x128xf32>
      %c0_28 = arith.constant 0 : index
      %c2_29 = arith.constant 2 : index
      %c0_30 = arith.constant 0 : index
      %42 = vector.load %arg4[%c0_28, %c2_29, %c0_30] : memref<1x8x128xf32, #tpu.memory_space<vmem>>, vector<1x1x128xf32>
      %43 = vector.shape_cast %42 : vector<1x1x128xf32> to vector<1x128xf32>
      %c0_31 = arith.constant 0 : index
      %c3 = arith.constant 3 : index
      %c0_32 = arith.constant 0 : index
      %44 = vector.load %arg4[%c0_31, %c3, %c0_32] : memref<1x8x128xf32, #tpu.memory_space<vmem>>, vector<1x1x128xf32>
      %45 = vector.shape_cast %44 : vector<1x1x128xf32> to vector<1x128xf32>
      %c0_33 = arith.constant 0 : index
      %c4 = arith.constant 4 : index
      %c0_34 = arith.constant 0 : index
      %46 = vector.load %arg4[%c0_33, %c4, %c0_34] : memref<1x8x128xf32, #tpu.memory_space<vmem>>, vector<1x1x128xf32>
      %47 = vector.shape_cast %46 : vector<1x1x128xf32> to vector<1x128xf32>
      %c0_35 = arith.constant 0 : index
      %c0_36 = arith.constant 0 : index
      %48 = vector.load %arg7[%c0_35, %c0_36] : memref<2x128xf32, #tpu.memory_space<vmem>>, vector<1x128xf32>
      %c1_37 = arith.constant 1 : index
      %c0_38 = arith.constant 0 : index
      %49 = vector.load %arg7[%c1_37, %c0_38] : memref<2x128xf32, #tpu.memory_space<vmem>>, vector<1x128xf32>
      %cst_39 = arith.constant 2.560000e+02 : f32
      %50 = vector.broadcast %cst_39 : f32 to vector<1x128xf32>
      %51 = arith.mulf %50, %43 : vector<1x128xf32>
      %52 = arith.addf %48, %51 : vector<1x128xf32>
      %cst_40 = arith.constant 2.000000e+00 : f32
      %53 = vector.broadcast %cst_40 : f32 to vector<1x128xf32>
      %54 = arith.mulf %53, %43 : vector<1x128xf32>
      %55 = arith.mulf %54, %48 : vector<1x128xf32>
      %56 = arith.addf %49, %55 : vector<1x128xf32>
      %cst_41 = arith.constant 2.560000e+02 : f32
      %57 = vector.broadcast %cst_41 : f32 to vector<1x128xf32>
      %58 = arith.mulf %57, %43 : vector<1x128xf32>
      %59 = arith.mulf %58, %43 : vector<1x128xf32>
      %60 = arith.addf %56, %59 : vector<1x128xf32>
      %61 = tpu.concatenate %52, %60 in 0 : vector<1x128xf32>, vector<1x128xf32> -> vector<2x128xf32>
      %c0_42 = arith.constant 0 : index
      %c0_43 = arith.constant 0 : index
      %62 = vector.load %arg5[%c0_42, %c0_43] : memref<128x128xf32, #tpu.memory_space<vmem>>, vector<128x128xf32>
      %cst_44 = arith.constant dense<0.000000e+00> : vector<2x128xf32>
      %63 = tpu.matmul %61, %62, %cst_44 {dimension_numbers = #tpu.dot_dimension_numbers<[1], [0], [0], [1], [0, 0, 1, 1], [], []>} : vector<2x128xf32>, vector<128x128xf32>, vector<2x128xf32> -> vector<2x128xf32>
      %64 = vector.extract_strided_slice %63 {offsets = [0, 0], sizes = [1, 128], strides = [1, 1]} : vector<2x128xf32> to vector<1x128xf32>
      %cst_45 = arith.constant 0.001953125 : f32
      %65 = vector.broadcast %cst_45 : f32 to vector<1x128xf32>
      %66 = arith.mulf %64, %65 : vector<1x128xf32>
      %67 = vector.extract_strided_slice %63 {offsets = [1, 0], sizes = [1, 128], strides = [1, 1]} : vector<2x128xf32> to vector<1x128xf32>
      %cst_46 = arith.constant 0.001953125 : f32
      %68 = vector.broadcast %cst_46 : f32 to vector<1x128xf32>
      %69 = arith.mulf %67, %68 : vector<1x128xf32>
      %70 = arith.mulf %66, %66 : vector<1x128xf32>
      %71 = arith.subf %69, %70 : vector<1x128xf32>
      %cst_47 = arith.constant 9.99999974E-6 : f32
      %72 = vector.broadcast %cst_47 : f32 to vector<1x128xf32>
      %73 = arith.addf %71, %72 : vector<1x128xf32>
      %74 = math.rsqrt %73 : vector<1x128xf32>
      %75 = arith.mulf %39, %74 : vector<1x128xf32>
      %76 = arith.mulf %75, %45 : vector<1x128xf32>
      %77 = arith.subf %43, %66 : vector<1x128xf32>
      %78 = arith.mulf %75, %77 : vector<1x128xf32>
      %79 = arith.addf %78, %41 : vector<1x128xf32>
      %80 = arith.mulf %79, %45 : vector<1x128xf32>
      %81 = arith.addf %80, %47 : vector<1x128xf32>
      %c0_i32_48 = arith.constant 0 : i32
      %c1_i32 = arith.constant 1 : i32
      %82 = arith.muli %c0_i32_48, %c1_i32 : i32
      %c0_i32_49 = arith.constant 0 : i32
      %83 = arith.addi %c0_i32_49, %82 : i32
      %c256_i32_50 = arith.constant 256 : i32
      %84 = arith.muli %83, %c256_i32_50 : i32
      %85 = tpu.assume_multiple %84, 8 : i32
      %c0_51 = arith.constant 0 : index
      %86 = arith.index_cast %85 : i32 to index
      %c0_52 = arith.constant 0 : index
      %87 = vector.load %arg6[%c0_51, %86, %c0_52] : memref<1x256x128xbf16, #tpu.memory_space<vmem>>, vector<1x256x128xbf16>
      %88 = vector.shape_cast %87 : vector<1x256x128xbf16> to vector<256x128xbf16>
      %89 = arith.extf %88 : vector<256x128xbf16> to vector<256x128xf32>
      %90 = vector.broadcast %76 : vector<1x128xf32> to vector<256x128xf32>
      %91 = arith.mulf %89, %90 : vector<256x128xf32>
      %92 = vector.broadcast %81 : vector<1x128xf32> to vector<256x128xf32>
      %93 = arith.addf %91, %92 : vector<256x128xf32>
      %94 = arith.negf %93 : vector<256x128xf32>
      %95 = math.exp %94 : vector<256x128xf32>
      %cst_53 = arith.constant 1.000000e+00 : f32
      %96 = vector.broadcast %cst_53 : f32 to vector<256x128xf32>
      %97 = arith.addf %96, %95 : vector<256x128xf32>
      %98 = arith.divf %96, %97 : vector<256x128xf32>
      %99 = arith.mulf %93, %98 : vector<256x128xf32>
      %100 = arith.truncf %99 : vector<256x128xf32> to vector<256x128xbf16>
      %c0_54 = arith.constant 0 : index
      %101 = arith.index_cast %85 : i32 to index
      %c0_55 = arith.constant 0 : index
      %102 = vector.load %arg6[%c0_54, %101, %c0_55] : memref<1x256x128xbf16, #tpu.memory_space<vmem>>, vector<1x256x128xbf16>
      %103 = vector.shape_cast %102 : vector<1x256x128xbf16> to vector<256x128xbf16>
      %104 = vector.shape_cast %100 : vector<256x128xbf16> to vector<1x256x128xbf16>
      tpu.vector_store %arg6[%c0_54, %101, %c0_55], %104 {strides = array<i32>} : memref<1x256x128xbf16, #tpu.memory_space<vmem>>, vector<1x256x128xbf16>,
      %c1_i32_56 = arith.constant 1 : i32
    } else {
    }
    return
  }
  func.func @transform_0(%arg0: i32, %arg1: i32) -> (i32, i32, i32, i32) {
    %c0_i32 = arith.constant 0 : i32
    %c0_i32_0 = arith.constant 0 : i32
    %c0_i32_1 = arith.constant 0 : i32
    return %arg0, %c0_i32, %arg1, %c0_i32_0 : i32, i32, i32, i32
  }
  func.func @transform_1(%arg0: i32, %arg1: i32) -> (i32, i32, i32) {
    %c0_i32 = arith.constant 0 : i32
    %c0_i32_0 = arith.constant 0 : i32
    %c0_i32_1 = arith.constant 0 : i32
    %c0_i32_2 = arith.constant 0 : i32
    return %c0_i32, %c0_i32_0, %c0_i32_1 : i32, i32, i32
  }
  func.func @transform_2(%arg0: i32, %arg1: i32) -> (i32, i32, i32) {
    %c0_i32 = arith.constant 0 : i32
    %c0_i32_0 = arith.constant 0 : i32
    %c0_i32_1 = arith.constant 0 : i32
    return %arg0, %c0_i32, %c0_i32_0 : i32, i32, i32
  }
  func.func @transform_3(%arg0: i32, %arg1: i32) -> (i32, i32) {
    %c0_i32 = arith.constant 0 : i32
    %c0_i32_0 = arith.constant 0 : i32
    %c0_i32_1 = arith.constant 0 : i32
    return %c0_i32, %c0_i32_0 : i32, i32
  }
  func.func @transform_4(%arg0: i32, %arg1: i32) -> (i32, i32, i32) {
    %c0_i32 = arith.constant 0 : i32
    %c0_i32_0 = arith.constant 0 : i32
    %c0_i32_1 = arith.constant 0 : i32
    return %arg0, %c0_i32, %c0_i32_0 : i32, i32, i32
  }
}

</mosaic_0001>

<bundles_post_ra>
// kernel: _lambda_.1
= control target key start
LH: loop header
LB: loop body
LE: loop exit
PB: predicated region body
PF: predicated region fallthrough
CT: control target
= control target key end

     0   :  { %s2632_s15 = smov 0   ;;  %s2634_s16 = smov 0   ;;  %s4313_s0 = inlined_call_operand.vmem [shape: bf16[2,18,16,12], index: 0, kind: input, shape index: {}]   ;;  %s4314_s1 = inlined_call_operand.vmem [shape: bf16[3,12,128], index: 1, kind: input, shape index: {}]   ;;  %s4315_s2 = inlined_call_operand.vmem [shape: f32[2,8,128], index: 2, kind: input, shape index: {}]   ;;  %s4316_s3 = inlined_call_operand.vmem [shape: f32[128,128], index: 3, kind: input, shape index: {}]   ;;  %s4317_s4 = inlined_call_operand.vmem [shape: bf16[2,256,128], index: 4, kind: output, shape index: {}]  }
   0x1   :  { %s2636_s17 = smov 0  }
   0x2 LB: > { %s26_s18 = sadd.s32 1, %s2600_s16  ;;  %p1960_p0 = scmp.ge.s32.totalorder %s2604_s17, 1  ;;  %s2604_s17 = sphi %s2636_s17, %s14_s17   ;;  %s2600_s16 = sphi %s2634_s16, %s4590_s16   ;;  %s2596_s15 = sphi %s2632_s15, %s4589_s15  }
   0x3   : > { %p28_p1 = scmp.ge.s32.totalorder %s26_s18, 2  ;;  %p190_p2 = scmp.lt.s32.totalorder %s2604_s17, 3 }
   0x5   : > { %s4592_s18 = smov (%p28_p1, %s26_s18), 0  ;;  %p191_p3 = pnand %p1960_p0, %p190_p2 }
   0x7   : > { %194 = sbr.rel (%p191_p3) target bundleno = 992 (0x3e0), region = 36 }
   0xc   : > { %v2033_v0 = vld [vmem:[%s4314_s1 + $0x8] sm:$0xf]  ;;  %v2155_v1 = vld [vmem:[%s4314_s1 + $0x8] sm:$0x30]  ;;  %vm419_vm0 = vcmask 1045504   ;;  %p225_p4 = scmp.lt.s32.totalorder %s2596_s15, 1 }
   0xd   : > { %v2034_v2 = vor.u32 %v2155_v1, %v2033_v0  ;;  %v2057_v3 = vld [vmem:[%s4314_s1] sm:$0xf]  ;;  %v2154_v4 = vld [vmem:[%s4314_s1] sm:$0x30]  ;;  %v2083_v5 = vld [vmem:[%s4314_s1 + $0x10] sm:$0xf] }
   0xe   : > { %v2058_v6 = vor.u32 %v2154_v4, %v2057_v3  ;;  %v2156_v7 = vld [vmem:[%s4314_s1 + $0x10] sm:$0x30]  ;;  %s4594_s15 = smov (!%p225_p4, %s2596_s15), 1  ;;  %vm370_vm1 = vcmask 97280   ;;  %vm872_vm2 = vcmask 1040384  }
   0xf   : > { %v421_v8 = vsel %vm419_vm0, %v2034_v2, 0  ;;  %v2084_v9 = vor.u32 %v2156_v7, %v2083_v5  ;;  %s2426_s5 = smul.u32 144, %s4594_s15  ;;  %s1962_s23 = sshll.u32 %s4594_s15, 3 }
  0x10   : > { %430 = vmatpush.bf16.msra.mxu0 %v421_v8  ;;  %v526_v10 = vsel %vm419_vm0, %v2058_v6, 0  ;;  %s2970_s26 = scalar_lea.vmem %s4315_s2, %s1962_s23  ;;  %s2135_s27 = sshll.u32 %s4594_s15, 7 }
  0x11   : > { %535 = vmatpush.bf16.msra.mxu1 %v526_v10  ;;  %v634_v11 = vsel %vm419_vm0, %v2084_v9, 0  ;;  %s2674_s8 = scalar_lea.vmem %s4313_s0, %s2426_s5  ;;  %s4265_s29 = scalar_lea.vmem %s4317_s4, %s2135_s27 }
  0x12   : > { %643 = vmatpush.bf16.msra.mxu2 %v634_v11  ;;  %v2137_v12 = vld [vmem:[%s2674_s8 + $0x8] sm:$0xff]  ;;  %v2136_v13 = vld [vmem:[%s2674_s8] sm:$0xff]  ;;  %v2138_v14 = vld [vmem:[%s2674_s8 + $0x10] sm:$0xff] }
  0x13   : > { %2035 = vmatmul.msk.bf16.vlgmr.msra.gmra.mxu0 %vm370_vm1, %v2137_v12  ;;  %v2139_v15 = vld [vmem:[%s2674_s8 + $0x18] sm:$0xff]  ;;  %v2140_v16 = vld [vmem:[%s2674_s8 + $0x20] sm:$0xff]  ;;  %v2141_v17 = vld [vmem:[%s2674_s8 + $0x28] sm:$0xff] }
  0x14   : > { %2059 = vmatmul.msk.bf16.vlgmr.msra.gmra.mxu1 %vm370_vm1, %v2136_v13  ;;  %v2142_v18 = vld [vmem:[%s2674_s8 + $0x30] sm:$0xff]  ;;  %v2143_v19 = vld [vmem:[%s2674_s8 + $0x38] sm:$0xff]  ;;  %v2144_v20 = vld [vmem:[%s2674_s8 + $0x40] sm:$0xff] }
  0x15   : > { %2085 = vmatmul.msk.bf16.vlgmr.msra.gmra.mxu2 %vm370_vm1, %v2138_v14  ;;  %v2145_v21 = vld [vmem:[%s2674_s8 + $0x48] sm:$0xff]  ;;  %v2146_v24 = vld [vmem:[%s2674_s8 + $0x50] sm:$0xff]  ;;  %v2147_v35 = vld [vmem:[%s2674_s8 + $0x58] sm:$0xff] }
  0x16   : > { %v2148_v46 = vld [vmem:[%s2674_s8 + $0x60] sm:$0xff]  ;;  %v2149_v57 = vld [vmem:[%s2674_s8 + $0x68] sm:$0xff]  ;;  %v2150_v4 = vld [vmem:[%s2674_s8 + $0x70] sm:$0xff] }
  0x17   : > { %v2151_v13 = vld [vmem:[%s2674_s8 + $0x78] sm:$0xff] }
  0x23   : > { %2036 = vmatmul.msk.bf16.gmra.mxu0 %vm370_vm1, %v2138_v14 }
  0x24   : > { %2060 = vmatmul.msk.bf16.gmra.mxu1 %vm370_vm1, %v2137_v12 }
  0x25   : > { %2086 = vmatmul.msk.bf16.gmra.mxu2 %vm370_vm1, %v2139_v15 }
  0x33   : > { %2037 = vmatmul.msk.bf16.gmra.mxu0 %vm370_vm1, %v2139_v15 }
  0x34   : > { %2061 = vmatmul.msk.bf16.gmra.mxu1 %vm370_vm1, %v2138_v14 }
  0x35   : > { %2087 = vmatmul.msk.bf16.gmra.mxu2 %vm370_vm1, %v2140_v16 }
  0x43   : > { %2038 = vmatmul.msk.bf16.gmra.mxu0 %vm370_vm1, %v2140_v16 }
  0x44   : > { %2062 = vmatmul.msk.bf16.gmra.mxu1 %vm370_vm1, %v2139_v15 }
  0x45   : > { %2088 = vmatmul.msk.bf16.gmra.mxu2 %vm370_vm1, %v2141_v17 }
  0x53   : > { %2039 = vmatmul.msk.bf16.gmra.mxu0 %vm370_vm1, %v2141_v17 }
  0x54   : > { %2063 = vmatmul.msk.bf16.gmra.mxu1 %vm370_vm1, %v2140_v16 }
  0x55   : > { %2089 = vmatmul.msk.bf16.gmra.mxu2 %vm370_vm1, %v2142_v18 }
  0x63   : > { %2040 = vmatmul.msk.bf16.gmra.mxu0 %vm370_vm1, %v2142_v18 }
  0x64   : > { %2064 = vmatmul.msk.bf16.gmra.mxu1 %vm370_vm1, %v2141_v17 }
  0x65   : > { %2090 = vmatmul.msk.bf16.gmra.mxu2 %vm370_vm1, %v2143_v19 }
  0x73   : > { %2041 = vmatmul.msk.bf16.gmra.mxu0 %vm370_vm1, %v2143_v19 }
  0x74   : > { %2065 = vmatmul.msk.bf16.gmra.mxu1 %vm370_vm1, %v2142_v18 }
  0x75   : > { %2091 = vmatmul.msk.bf16.gmra.mxu2 %vm370_vm1, %v2144_v20 }
  0x83   : > { %2042 = vmatmul.msk.bf16.gmra.mxu0 %vm370_vm1, %v2144_v20 }
  0x84   : > { %2066 = vmatmul.msk.bf16.gmra.mxu1 %vm370_vm1, %v2143_v19 }
  0x85   : > { %2092 = vmatmul.msk.bf16.gmra.mxu2 %vm370_vm1, %v2145_v21 }
  0x90   : > { %v432_v22 = vpop.f32.mrf.mxu0 }
  0x91   : > { %v537_v23 = vpop.f32.mrf.mxu1 }
  0x92   : > { %v538_v25 = vadd.f32 %v537_v23, %v432_v22 }
  0x93   : > { %2043 = vmatmul.msk.bf16.gmra.mxu0 %vm370_vm1, %v2145_v21 }
  0x94   : > { %2067 = vmatmul.msk.bf16.gmra.mxu1 %vm370_vm1, %v2144_v20 }
  0x95   : > { %2093 = vmatmul.msk.bf16.gmra.mxu2 %vm370_vm1, %v2146_v24 }
  0x98   : > { %v645_v26 = vpop.f32.mrf.mxu2  ;;  %v434_v28 = vpop.f32.mrf.mxu0 }
  0x99   : > { %v2714_v27 = vadd.f32 %v645_v26, %v538_v25  ;;  %v539_v29 = vpop.f32.mrf.mxu1 }
  0x9a   : > { %v540_v30 = vadd.f32 %v539_v29, %v434_v28 }
  0xa0   : > { %v647_v31 = vpop.f32.mrf.mxu2  ;;  %v437_v33 = vpop.f32.mrf.mxu0 }
  0xa1   : > { %v2716_v32 = vadd.f32 %v647_v31, %v540_v30  ;;  %v542_v34 = vpop.f32.mrf.mxu1 }
  0xa2   : > { %v543_v36 = vadd.f32 %v542_v34, %v437_v33 }
  0xa3   : > { %2044 = vmatmul.msk.bf16.gmra.mxu0 %vm370_vm1, %v2146_v24 }
  0xa4   : > { %2068 = vmatmul.msk.bf16.gmra.mxu1 %vm370_vm1, %v2145_v21 }
  0xa5   : > { %2094 = vmatmul.msk.bf16.gmra.mxu2 %vm370_vm1, %v2147_v35 }
  0xa8   : > { %v650_v37 = vpop.f32.mrf.mxu2  ;;  %v439_v39 = vpop.f32.mrf.mxu0 }
  0xa9   : > { %v2722_v38 = vadd.f32 %v650_v37, %v543_v36  ;;  %v544_v40 = vpop.f32.mrf.mxu1 }
  0xaa   : > { %v545_v41 = vadd.f32 %v544_v40, %v439_v39  ;;  %v2153_v39 = vld [vmem:[%s2674_s8 + $0x88] sm:$0xff] }
  0xb0   : > { %v652_v42 = vpop.f32.mrf.mxu2  ;;  %v442_v44 = vpop.f32.mrf.mxu0 }
  0xb1   : > { %v2724_v43 = vadd.f32 %v652_v42, %v545_v41  ;;  %v547_v45 = vpop.f32.mrf.mxu1 }
  0xb2   : > { %v548_v47 = vadd.f32 %v547_v45, %v442_v44 }
  0xb3   : > { %2045 = vmatmul.msk.bf16.gmra.mxu0 %vm370_vm1, %v2147_v35 }
  0xb4   : > { %2069 = vmatmul.msk.bf16.gmra.mxu1 %vm370_vm1, %v2146_v24  ;;  %v2152_v24 = vld [vmem:[%s2674_s8 + $0x80] sm:$0xff] }
  0xb5   : > { %2095 = vmatmul.msk.bf16.gmra.mxu2 %vm370_vm1, %v2148_v46 }
  0xb8   : > { %v655_v48 = vpop.f32.mrf.mxu2  ;;  %v444_v50 = vpop.f32.mrf.mxu0 }
  0xb9   : > { %v2730_v49 = vadd.f32 %v655_v48, %v548_v47  ;;  %v549_v51 = vpop.f32.mrf.mxu1 }
  0xba   : > { %v550_v52 = vadd.f32 %v549_v51, %v444_v50 }
  0xc0   : > { %v657_v53 = vpop.f32.mrf.mxu2  ;;  %v447_v55 = vpop.f32.mrf.mxu0 }
  0xc1   : > { %v2732_v54 = vadd.f32 %v657_v53, %v550_v52  ;;  %v552_v56 = vpop.f32.mrf.mxu1 }
  0xc2   : > { %v553_v58 = vadd.f32 %v552_v56, %v447_v55 }
  0xc3   : > { %2046 = vmatmul.msk.bf16.gmra.mxu0 %vm370_vm1, %v2148_v46 }
  0xc4   : > { %2070 = vmatmul.msk.bf16.gmra.mxu1 %vm370_vm1, %v2147_v35 }
  0xc5   : > { %2096 = vmatmul.msk.bf16.gmra.mxu2 %vm370_vm1, %v2149_v57 }
  0xc8   : > { %v660_v59 = vpop.f32.mrf.mxu2  ;;  %v449_v61 = vpop.f32.mrf.mxu0 }
  0xc9   : > { %v2738_v60 = vadd.f32 %v660_v59, %v553_v58  ;;  %v554_v62 = vpop.f32.mrf.mxu1 }
  0xca   : > { %v555_v63 = vadd.f32 %v554_v62, %v449_v61 }
  0xd0   : > { %v662_v0 = vpop.f32.mrf.mxu2  ;;  %v452_v2 = vpop.f32.mrf.mxu0 }
  0xd1   : > { %v2740_v1 = vadd.f32 %v662_v0, %v555_v63  ;;  %v557_v3 = vpop.f32.mrf.mxu1 }
  0xd2   : > { %v558_v5 = vadd.f32 %v557_v3, %v452_v2 }
  0xd3   : > { %2047 = vmatmul.msk.bf16.gmra.mxu0 %vm370_vm1, %v2149_v57 }
  0xd4   : > { %2071 = vmatmul.msk.bf16.gmra.mxu1 %vm370_vm1, %v2148_v46 }
  0xd5   : > { %2097 = vmatmul.msk.bf16.gmra.mxu2 %vm370_vm1, %v2150_v4 }
  0xd8   : > { %v665_v6 = vpop.f32.mrf.mxu2  ;;  %v454_v8 = vpop.f32.mrf.mxu0 }
  0xd9   : > { %v2746_v7 = vadd.f32 %v665_v6, %v558_v5  ;;  %v559_v9 = vpop.f32.mrf.mxu1 }
  0xda   : > { %v560_v62 = vadd.f32 %v559_v9, %v454_v8 }
  0xe0   : > { %v667_v10 = vpop.f32.mrf.mxu2  ;;  %v457_v11 = vpop.f32.mrf.mxu0 }
  0xe1   : > { %v562_v12 = vpop.f32.mrf.mxu1  ;;  %v2791_v63 = vadd.f32 %v667_v10, %v560_v62 }
  0xe2   : > { %v563_v17 = vadd.f32 %v562_v12, %v457_v11 }
  0xe3   : > { %2048 = vmatmul.msk.bf16.gmra.mxu0 %vm370_vm1, %v2150_v4 }
  0xe4   : > { %2072 = vmatmul.msk.bf16.gmra.mxu1 %vm370_vm1, %v2149_v57 }
  0xe5   : > { %2098 = vmatmul.msk.bf16.gmra.mxu2 %vm370_vm1, %v2151_v13 }
  0xe8   : > { %v670_v14 = vpop.f32.mrf.mxu2  ;;  %v459_v15 = vpop.f32.mrf.mxu0 }
  0xe9   : > { %v564_v16 = vpop.f32.mrf.mxu1  ;;  %v2752_v20 = vadd.f32 %v670_v14, %v563_v17 }
  0xea   : > { %v565_v18 = vadd.f32 %v564_v16, %v459_v15 }
  0xf0   : > { %v672_v19 = vpop.f32.mrf.mxu2  ;;  %v462_v22 = vpop.f32.mrf.mxu0 }
  0xf1   : > { %v2754_v21 = vadd.f32 %v672_v19, %v565_v18  ;;  %v567_v23 = vpop.f32.mrf.mxu1 }
  0xf2   : > { %v568_v30 = vadd.f32 %v567_v23, %v462_v22 }
  0xf3   : > { %v2759_v25 = vpack.c.bf16 %v2754_v21, %v2752_v20  ;;  %2049 = vmatmul.msk.bf16.gmra.mxu0 %vm370_vm1, %v2151_v13 }
  0xf4   : > { %2073 = vmatmul.msk.bf16.gmra.mxu1 %vm370_vm1, %v2150_v4 }
  0xf5   : > { %2099 = vmatmul.msk.bf16.gmra.mxu2 %vm370_vm1, %v2152_v24 }
  0xf8   : > { %v675_v26 = vpop.f32.mrf.mxu2  ;;  %v464_v28 = vpop.f32.mrf.mxu0 }
  0xf9   : > { %v569_v29 = vpop.f32.mrf.mxu1  ;;  %v2764_v34 = vadd.f32 %v675_v26, %v568_v30 }
  0xfa   : > { %v570_v31 = vadd.f32 %v569_v29, %v464_v28 }
 0x100   : > { %v677_v33 = vpop.f32.mrf.mxu2  ;;  %v467_v36 = vpop.f32.mrf.mxu0 }
 0x101   : > { %v2766_v35 = vadd.f32 %v677_v33, %v570_v31  ;;  %v572_v37 = vpop.f32.mrf.mxu1 }
 0x102   : > { %v573_v45 = vadd.f32 %v572_v37, %v467_v36 }
 0x103   : > { %v2771_v40 = vpack.c.bf16 %v2766_v35, %v2764_v34  ;;  %2050 = vmatmul.msk.bf16.gmra.mxu0 %vm370_vm1, %v2152_v24 }
 0x104   : > { %2074 = vmatmul.msk.bf16.gmra.mxu1 %vm370_vm1, %v2151_v13 }
 0x105   : > { %2100 = vmatmul.msk.bf16.gmra.mxu2 %vm370_vm1, %v2153_v39 }
 0x108   : > { %v680_v41 = vpop.f32.mrf.mxu2  ;;  %v469_v42 = vpop.f32.mrf.mxu0 }
 0x109   : > { %v574_v44 = vpop.f32.mrf.mxu1  ;;  %v2776_v48 = vadd.f32 %v680_v41, %v573_v45 }
 0x10a   : > { %v575_v46 = vadd.f32 %v574_v44, %v469_v42 }
 0x110   : > { %v682_v47 = vpop.f32.mrf.mxu2  ;;  %v472_v51 = vpop.f32.mrf.mxu0 }
 0x111   : > { %v2778_v50 = vadd.f32 %v682_v47, %v575_v46  ;;  %v577_v52 = vpop.f32.mrf.mxu1 }
 0x112   : > { %v578_v53 = vadd.f32 %v577_v52, %v472_v51 }
 0x113   : > { %v2782_v55 = vpack.c.bf16 %v2778_v50, %v2776_v48  ;;  %757 = vmatpush.msra.mxu3 %v2778_v50 }
 0x115   : > { %758 = vmatpush.msra.mxu3 %v2776_v48 }
 0x117   : > { %759 = vmatpush.msra.mxu3 %v2766_v35 }
 0x118   : > { %v685_v56 = vpop.f32.mrf.mxu2  ;;  %v474_v58 = vpop.f32.mrf.mxu0 }
 0x119   : > { %v2787_v57 = vadd.f32 %v685_v56, %v578_v53  ;;  %760 = vmatpush.msra.mxu3 %v2764_v34  ;;  %v579_v59 = vpop.f32.mrf.mxu1 }
 0x11a   : > { %v580_v61 = vadd.f32 %v579_v59, %v474_v58 }
 0x11b   : > { %761 = vmatpush.msra.mxu3 %v2754_v21 }
 0x11d   : > { %762 = vmatpush.msra.mxu3 %v2752_v20 }
 0x11f   : > { %763 = vmatpush.msra.mxu3 %v2791_v63 }
 0x120   : > { %v687_v0 = vpop.f32.mrf.mxu2  ;;  %v477_v3 = vpop.f32.mrf.mxu0 }
 0x121   : > { %v2795_v2 = vadd.f32 %v687_v0, %v580_v61  ;;  %764 = vmatpush.msra.mxu3 %v2746_v7  ;;  %v582_v4 = vpop.f32.mrf.mxu1 }
 0x122   : > { %v583_v5 = vadd.f32 %v582_v4, %v477_v3 }
 0x123   : > { %765 = vmatpush.msra.mxu3 %v2740_v1 }
 0x125   : > { %766 = vmatpush.msra.mxu3 %v2738_v60 }
 0x127   : > { %767 = vmatpush.msra.mxu3 %v2732_v54 }
 0x128   : > { %v690_v6 = vpop.f32.mrf.mxu2  ;;  %v479_v9 = vpop.f32.mrf.mxu0 }
 0x129   : > { %v2801_v8 = vadd.f32 %v690_v6, %v583_v5  ;;  %768 = vmatpush.msra.mxu3 %v2730_v49  ;;  %v584_v10 = vpop.f32.mrf.mxu1 }
 0x12a   : > { %v585_v11 = vadd.f32 %v584_v10, %v479_v9 }
 0x12b   : > { %769 = vmatpush.msra.mxu3 %v2724_v43 }
 0x12d   : > { %770 = vmatpush.msra.mxu3 %v2722_v38 }
 0x12f   : > { %771 = vmatpush.msra.mxu3 %v2716_v32 }
 0x130   : > { %v692_v12 = vpop.f32.mrf.mxu2  ;;  %v482_v14 = vpop.f32.mrf.mxu0 }
 0x131   : > { %v2807_v13 = vadd.f32 %v692_v12, %v585_v11  ;;  %772 = vmatpush.msra.mxu3 %v2714_v27  ;;  %v587_v15 = vpop.f32.mrf.mxu1 }
 0x132   : > { %v588_v16 = vadd.f32 %v587_v15, %v482_v14 }
 0x138   : > { %v695_v17 = vpop.f32.mrf.mxu2  ;;  %v484_v19 = vpop.f32.mrf.mxu0 }
 0x139   : > { %v2810_v18 = vadd.f32 %v695_v17, %v588_v16  ;;  %v589_v22 = vpop.f32.mrf.mxu1 }
 0x13a   : > { %v590_v23 = vadd.f32 %v589_v22, %v484_v19 }
 0x140   : > { %v697_v24 = vpop.f32.mrf.mxu2  ;;  %v487_v28 = vpop.f32.mrf.mxu0 }
 0x141   : > { %v2812_v26 = vadd.f32 %v697_v24, %v590_v23  ;;  %v592_v29 = vpop.f32.mrf.mxu1 }
 0x142   : > { %v593_v30 = vadd.f32 %v592_v29, %v487_v28 }
 0x148   : > { %v700_v31 = vpop.f32.mrf.mxu2  ;;  %v489_v36 = vpop.f32.mrf.mxu0 }
 0x149   : > { %v2814_v33 = vadd.f32 %v700_v31, %v593_v30  ;;  %v594_v37 = vpop.f32.mrf.mxu1 }
 0x14a   : > { %v595_v39 = vadd.f32 %v594_v37, %v489_v36  ;;  %v2606_v36 = vmov 1.0  }
 0x14b   : > { %773 = vmatmul.f32.vlgmr.msra.gmra.mxu3 %v2606_v36 }
 0x150   : > { %v702_v41 = vpop.f32.mrf.mxu2  ;;  %v492_v44 = vpop.f32.mrf.mxu0 }
 0x151   : > { %v2816_v42 = vadd.f32 %v702_v41, %v595_v39  ;;  %v597_v45 = vpop.f32.mrf.mxu1 }
 0x152   : > { %v598_v46 = vadd.f32 %v597_v45, %v492_v44 }
 0x158   : > { %v705_v47 = vpop.f32.mrf.mxu2  ;;  %v494_v52 = vpop.f32.mrf.mxu0 }
 0x159   : > { %v2818_v51 = vadd.f32 %v705_v47, %v598_v46  ;;  %v599_v53 = vpop.f32.mrf.mxu1 }
 0x160   : > { %v707_v56 = vpop.f32.mrf.mxu2  ;;  %v497_v58 = vpop.f32.mrf.mxu0 }
 0x161   : > { %v602_v59 = vpop.f32.mrf.mxu1 }
 0x162   : > { %v603_v3 = vadd.f32 %v602_v59, %v497_v58  ;;  %v600_v59 = vadd.f32 %v599_v53, %v494_v52  ;;  %v812_v52 = vmul.f32 %v2778_v50, %v2778_v50  ;;  %v811_v53 = vmul.f32 %v2776_v48, %v2776_v48 }
 0x163   : > { %v808_v50 = vmul.f32 %v2754_v21, %v2754_v21  ;;  %v806_v48 = vmul.f32 %v2791_v63, %v2791_v63  ;;  %v803_v21 = vmul.f32 %v2738_v60, %v2738_v60 }
 0x168   : > { %v710_v61 = vpop.f32.mrf.mxu2  ;;  %v499_v62 = vpop.f32.mrf.mxu0 }
 0x169   : > { %v604_v0 = vpop.f32.mrf.mxu1  ;;  %v2820_v6 = vadd.f32 %v710_v61, %v603_v3  ;;  %v2842_v61 = vadd.f32 %v707_v56, %v600_v59  ;;  %v810_v56 = vmul.f32 %v2766_v35, %v2766_v35  ;;  %v805_v35 = vmul.f32 %v2746_v7, %v2746_v7  ;;  %v986_v59 = vld [vmem:[%s4316_s3 + $0x50] sm:$0xff] }
 0x16a   : > { %v605_v4 = vadd.f32 %v604_v0, %v499_v62  ;;  %v809_v62 = vmul.f32 %v2764_v34, %v2764_v34  ;;  %v807_v0 = vmul.f32 %v2752_v20, %v2752_v20  ;;  %v804_v34 = vmul.f32 %v2740_v1, %v2740_v1 }
 0x16b   : > { %v802_v20 = vmul.f32 %v2732_v54, %v2732_v54  ;;  %v801_v3 = vmul.f32 %v2730_v49, %v2730_v49 }
 0x170   : > { %v712_v5 = vpop.f32.mrf.mxu2  ;;  %v502_v10 = vpop.f32.mrf.mxu0 }
 0x171   : > { %v2822_v9 = vadd.f32 %v712_v5, %v605_v4  ;;  %v607_v11 = vpop.f32.mrf.mxu1  ;;  %v800_v4 = vmul.f32 %v2724_v43, %v2724_v43  ;;  %v799_v5 = vmul.f32 %v2722_v38, %v2722_v38 }
 0x172   : > { %v608_v17 = vadd.f32 %v607_v11, %v502_v10  ;;  %v798_v10 = vmul.f32 %v2716_v32, %v2716_v32  ;;  %v797_v11 = vmul.f32 %v2714_v27, %v2714_v27 }
 0x173   : > { %v2826_v12 = vpack.c.bf16 %v2822_v9, %v2820_v6 }
 0x178   : > { %v715_v14 = vpop.f32.mrf.mxu2  ;;  %v504_v15 = vpop.f32.mrf.mxu0 }
 0x179   : > { %v609_v16 = vpop.f32.mrf.mxu1  ;;  %v2828_v23 = vadd.f32 %v715_v14, %v608_v17 }
 0x17a   : > { %v610_v19 = vadd.f32 %v609_v16, %v504_v15 }
 0x17b   : > { %v825_v17 = vmul.f32 %v2828_v23, %v2828_v23 }
 0x180   : > { %v717_v22 = vpop.f32.mrf.mxu2  ;;  %v507_v28 = vpop.f32.mrf.mxu0 }
 0x181   : > { %v2830_v24 = vadd.f32 %v717_v22, %v610_v19  ;;  %v612_v29 = vpop.f32.mrf.mxu1  ;;  %v824_v19 = vmul.f32 %v2822_v9, %v2822_v9  ;;  %v823_v22 = vmul.f32 %v2820_v6, %v2820_v6 }
 0x182   : > { %v613_v41 = vadd.f32 %v612_v29, %v507_v28  ;;  %v822_v28 = vmul.f32 %v2842_v61, %v2842_v61  ;;  %v817_v29 = vmul.f32 %v2810_v18, %v2810_v18 }
 0x183   : > { %v2834_v30 = vpack.c.bf16 %v2830_v24, %v2828_v23  ;;  %v826_v16 = vmul.f32 %v2830_v24, %v2830_v24 }
 0x188   : > { %v720_v31 = vpop.f32.mrf.mxu2  ;;  %v509_v37 = vpop.f32.mrf.mxu0 }
 0x189   : > { %v614_v39 = vpop.f32.mrf.mxu1  ;;  %v755_v46 = vadd.f32 %v720_v31, %v613_v41  ;;  %v816_v31 = vmul.f32 %v2807_v13, %v2807_v13  ;;  %v813_v41 = vmul.f32 %v2787_v57, %v2787_v57 }
 0x18a   : > { %v615_v44 = vadd.f32 %v614_v39, %v509_v37  ;;  %v815_v37 = vmul.f32 %v2801_v8, %v2801_v8  ;;  %v814_v39 = vmul.f32 %v2795_v2, %v2795_v2 }
 0x18b   : > { %v827_v15 = vmul.f32 %v755_v46, %v755_v46 }
 0x190   : > { %v722_v45 = vpop.f32.mrf.mxu2 }
 0x191   : > { %v756_v47 = vadd.f32 %v722_v45, %v615_v44  ;;  %v991_v44 = vld [vmem:[%s4316_s3 + $0x78] sm:$0xff]  ;;  %v990_v45 = vld [vmem:[%s4316_s3 + $0x70] sm:$0xff] }
 0x193   : > { %v2837_v58 = vpack.c.bf16 %v756_v47, %v755_v46  ;;  %777 = vmatpush.msrb.mxu3 %v756_v47  ;;  %v828_v14 = vmul.f32 %v756_v47, %v756_v47  ;;  %v988_v47 = vld [vmem:[%s4316_s3 + $0x60] sm:$0xff] }
 0x195   : > { %778 = vmatpush.msrb.mxu3 %v755_v46  ;;  %v989_v46 = vld [vmem:[%s4316_s3 + $0x68] sm:$0xff] }
 0x197   : > { %779 = vmatpush.msrb.mxu3 %v2830_v24  ;;  %v821_v24 = vmul.f32 %v2818_v51, %v2818_v51 }
 0x199   : > { %780 = vmatpush.msrb.mxu3 %v2828_v23  ;;  %v820_v23 = vmul.f32 %v2816_v42, %v2816_v42 }
 0x19b   : > { %781 = vmatpush.msrb.mxu3 %v2822_v9  ;;  %v819_v9 = vmul.f32 %v2814_v33, %v2814_v33 }
 0x19d   : > { %782 = vmatpush.msrb.mxu3 %v2820_v6  ;;  %v818_v6 = vmul.f32 %v2812_v26, %v2812_v26 }
 0x19f   : > { %783 = vmatpush.msrb.mxu3 %v2842_v61 }
 0x1a1   : > { %784 = vmatpush.msrb.mxu3 %v2818_v51 }
 0x1a3   : > { %785 = vmatpush.msrb.mxu3 %v2816_v42 }
 0x1a5   : > { %786 = vmatpush.msrb.mxu3 %v2814_v33 }
 0x1a7   : > { %787 = vmatpush.msrb.mxu3 %v2812_v26 }
 0x1a9   : > { %788 = vmatpush.msrb.mxu3 %v2810_v18 }
 0x1ab   : > { %789 = vmatpush.msrb.mxu3 %v2807_v13 }
 0x1ad   : > { %790 = vmatpush.msrb.mxu3 %v2801_v8 }
 0x1af   : > { %791 = vmatpush.msrb.mxu3 %v2795_v2 }
 0x1b1   : > { %792 = vmatpush.msrb.mxu3 %v2787_v57 }
 0x1b2   : > { %793 = vmatmul.f32.vlgmr.msrb.gmra.mxu3 %v2606_v36 }
 0x1b3   : > { %829 = vmatpush.msra.mxu3 %v812_v52  ;;  %v985_v52 = vld [vmem:[%s4316_s3 + $0x48] sm:$0xff] }
 0x1b5   : > { %830 = vmatpush.msra.mxu3 %v811_v53 }
 0x1b7   : > { %831 = vmatpush.msra.mxu3 %v810_v56  ;;  %v984_v56 = vld [vmem:[%s4316_s3 + $0x40] sm:$0xff] }
 0x1b9   : > { %832 = vmatpush.msra.mxu3 %v809_v62  ;;  %v983_v62 = vld [vmem:[%s4316_s3 + $0x38] sm:$0xff] }
 0x1bb   : > { %833 = vmatpush.msra.mxu3 %v808_v50  ;;  %v982_v50 = vld [vmem:[%s4316_s3 + $0x30] sm:$0xff] }
 0x1bd   : > { %834 = vmatpush.msra.mxu3 %v807_v0  ;;  %v981_v0 = vld [vmem:[%s4316_s3 + $0x28] sm:$0xff] }
 0x1bf   : > { %835 = vmatpush.msra.mxu3 %v806_v48  ;;  %v980_v48 = vld [vmem:[%s4316_s3 + $0x20] sm:$0xff] }
 0x1c1   : > { %836 = vmatpush.msra.mxu3 %v805_v35  ;;  %v979_v35 = vld [vmem:[%s4316_s3 + $0x18] sm:$0xff] }
 0x1c3   : > { %837 = vmatpush.msra.mxu3 %v804_v34 }
 0x1c5   : > { %838 = vmatpush.msra.mxu3 %v803_v21  ;;  %v978_v21 = vld [vmem:[%s4316_s3 + $0x10] sm:$0xff] }
 0x1c7   : > { %839 = vmatpush.msra.mxu3 %v802_v20  ;;  %v977_v20 = vld [vmem:[%s4316_s3 + $0x8] sm:$0xff] }
 0x1c9   : > { %840 = vmatpush.msra.mxu3 %v801_v3  ;;  %v976_v3 = vld [vmem:[%s4316_s3] sm:$0xff] }
 0x1cb   : > { %841 = vmatpush.msra.mxu3 %v800_v4 }
 0x1cd   : > { %842 = vmatpush.msra.mxu3 %v799_v5 }
 0x1ce   : > { %v774_v53 = vpop.f32.mrf.mxu3 }
 0x1cf   : > { %843 = vmatpush.msra.mxu3 %v798_v10 }
 0x1d1   : > { %844 = vmatpush.msra.mxu3 %v797_v11 }
 0x1d2   : > { %845 = vmatmul.f32.vlgmr.msra.gmra.mxu3 %v2606_v36 }
 0x1d3   : > { %849 = vmatpush.msrb.mxu3 %v828_v14 }
 0x1d5   : > { %850 = vmatpush.msrb.mxu3 %v827_v15 }
 0x1d7   : > { %851 = vmatpush.msrb.mxu3 %v826_v16  ;;  %v960_v16 = vld [vmem:[%s2970_s26 + $0x2] sm:$0x1] }
 0x1d9   : > { %852 = vmatpush.msrb.mxu3 %v825_v17  ;;  %v967_v17 = vmul.f32 2.0, %v960_v16 }
 0x1db   : > { %853 = vmatpush.msrb.mxu3 %v824_v19  ;;  %v965_v19 = vmul.f32 256.0, %v960_v16 }
 0x1dd   : > { %854 = vmatpush.msrb.mxu3 %v823_v22 }
 0x1df   : > { %855 = vmatpush.msrb.mxu3 %v822_v28 }
 0x1e1   : > { %856 = vmatpush.msrb.mxu3 %v821_v24  ;;  %v970_v24 = vmul.f32 %v965_v19, %v960_v16 }
 0x1e3   : > { %857 = vmatpush.msrb.mxu3 %v820_v23 }
 0x1e5   : > { %858 = vmatpush.msrb.mxu3 %v819_v9 }
 0x1e7   : > { %859 = vmatpush.msrb.mxu3 %v818_v6 }
 0x1e9   : > { %860 = vmatpush.msrb.mxu3 %v817_v29 }
 0x1eb   : > { %861 = vmatpush.msrb.mxu3 %v816_v31 }
 0x1ed   : > { %862 = vmatpush.msrb.mxu3 %v815_v37 }
 0x1ef   : > { %863 = vmatpush.msrb.mxu3 %v814_v39 }
 0x1f1   : > { %864 = vmatpush.msrb.mxu3 %v813_v41 }
 0x1f2   : > { %865 = vmatmul.f32.vlgmr.msrb.gmra.mxu3 %v2606_v36  ;;  %v987_v36 = vld [vmem:[%s4316_s3 + $0x58] sm:$0xff] }
 0x1f3   : > { %992 = vmatpush.msra.mxu3 %v991_v44 }
 0x1f5   : > { %993 = vmatpush.msra.mxu3 %v990_v45 }
 0x1f7   : > { %994 = vmatpush.msra.mxu3 %v989_v46 }
 0x1f9   : > { %995 = vmatpush.msra.mxu3 %v988_v47 }
 0x1fb   : > { %996 = vmatpush.msra.mxu3 %v987_v36 }
 0x1fd   : > { %997 = vmatpush.msra.mxu3 %v986_v59 }
 0x1ff   : > { %998 = vmatpush.msra.mxu3 %v985_v52 }
 0x201   : > { %999 = vmatpush.msra.mxu3 %v984_v56 }
 0x203   : > { %1000 = vmatpush.msra.mxu3 %v983_v62 }
 0x205   : > { %1001 = vmatpush.msra.mxu3 %v982_v50  ;;  %v958_v50 = vld [vmem:[%s2970_s26] sm:$0x1] }
 0x207   : > { %1002 = vmatpush.msra.mxu3 %v981_v0 }
 0x209   : > { %1003 = vmatpush.msra.mxu3 %v980_v48 }
 0x20b   : > { %1004 = vmatpush.msra.mxu3 %v979_v35  ;;  %v961_v35 = vld [vmem:[%s2970_s26 + $0x3] sm:$0x1] }
 0x20d   : > { %1005 = vmatpush.msra.mxu3 %v978_v21 }
 0x20f   : > { %1006 = vmatpush.msra.mxu3 %v977_v20  ;;  %v959_v20 = vld [vmem:[%s2970_s26 + $0x1] sm:$0x1] }
 0x211   : > { %1007 = vmatpush.msra.mxu3 %v976_v3  ;;  %v2180_v3 = vpack.c.bf16 %v2791_v63, %v2746_v7 }
 0x213   : > { %v2255_v7 = vunpack.c.l.bf16 %v2180_v3  ;;  %v2256_v63 = vunpack.c.h.bf16 %v2180_v3 }
 0x235   : > { %v794_v34 = vpop.f32.mrf.mxu3 }
 0x236   : > { %v795_v11 = vadd.f32 %v794_v34, %v774_v53 }
 0x255   : > { %v846_v4 = vpop.f32.mrf.mxu3 }
 0x275   : > { %v866_v5 = vpop.f32.mrf.mxu3 }
 0x276   : > { %v867_v10 = vadd.f32 %v866_v5, %v846_v4 }
 0x278   : > { %v870_v14 = vrot.slane %v867_v10, 7  ;;  %v2220_v10 = vpack.c.bf16 %v2842_v61, %v2818_v51  ;;  %v2260_v51 = vunpack.c.h.bf16 %v2759_v25  ;;  %v2263_v61 = vunpack.c.l.bf16 %v2771_v40 }
 0x27a   : > { %v873_v15 = vsel %vm872_vm2, %v795_v11, %v870_v14 }
 0x27b   : > { %878 = vst [vmem:[#allocation2] sm:$0x3] %v873_v15  ;;  %v2160_v15 = vpack.c.bf16 %v2716_v32, %v2714_v27  ;;  %v2267_v27 = vunpack.c.l.bf16 %v2782_v55  ;;  %v962_v32 = vld [vmem:[%s2970_s26 + $0x4] sm:$0x1] }
 0x282   : > { %v963_v22 = vld [vmem:[#allocation2] sm:$0x1]  ;;  %v964_v23 = vld [vmem:[#allocation2 + $0x1] sm:$0x1] }
 0x283   : > { %v968_v28 = vmul.f32 %v967_v17, %v963_v22  ;;  %v966_v29 = vadd.f32 %v965_v19, %v963_v22  ;;  %v2165_v17 = vpack.c.bf16 %v2724_v43, %v2722_v38  ;;  %v2259_v19 = vunpack.c.l.bf16 %v2759_v25 }
 0x284   : > { %v2268_v38 = vunpack.c.h.bf16 %v2782_v55  ;;  %v2287_v43 = vunpack.c.l.bf16 %v2220_v10  ;;  %v2291_v55 = vunpack.c.l.bf16 %v2826_v12 }
 0x285   : > { %v969_v9 = vadd.f32 %v968_v28, %v964_v23  ;;  %v2264_v28 = vunpack.c.h.bf16 %v2771_v40 }
 0x287   : > { %v971_v6 = vadd.f32 %v970_v24, %v969_v9 }
 0x289   : > { %v973_v31 = vrot.slane %v971_v6, 7  ;;  %v2288_v6 = vunpack.c.h.bf16 %v2220_v10 }
 0x28b   : > { %v975_v37 = vsel %vm872_vm2, %v966_v29, %v973_v31 }
 0x28c   : > { %1008 = vmatmul.f32.vlgmr.msra.gmra.mxu3 %v975_v37  ;;  %v2292_v37 = vunpack.c.h.bf16 %v2826_v12 }
 0x30f   : > { %v1009_v39 = vpop.f32.mrf.mxu3 }
 0x310   : > { %v1012_v41 = vmul.f32 0.001953125, %v1009_v39  ;;  %v2295_v39 = vunpack.c.l.bf16 %v2834_v30 }
 0x312   : > { %v1013_v44 = vmul.f32 %v1012_v41, %v1012_v41  ;;  %v1034_v21 = vsub.f32 %v960_v16, %v1012_v41  ;;  %v2990_v16 = vpack.c.bf16 %v2732_v54, %v2730_v49 }
 0x314   : > { %v1015_v45 = vrot.slane %v1013_v44, 7  ;;  %v2299_v44 = vunpack.c.l.bf16 %v2837_v58 }
 0x316   : > { %v1017_v46 = vsub.f32 %v1012_v41, %v1015_v45  ;;  %v2296_v41 = vunpack.c.h.bf16 %v2834_v30  ;;  %v2300_v45 = vunpack.c.h.bf16 %v2837_v58  ;;  %v2240_v58 = vunpack.c.h.bf16 %v2160_v15 }
 0x318   : > { %v1018_v47 = vadd.f32 1e-05, %v1017_v46 }
 0x31a   : > { %2452 = vrsqrt.f32 %v1018_v47  ;;  %vm1025_vm4 = vweird.f32 %v1018_v47 }
 0x320   : > { %v2453_v36 = vpop.eup %2452 }
 0x321   : > { %v1020_v59 = vmul.f32 %v2453_v36, %v1018_v47  ;;  %vm1026_vm3 = vweird.f32 %v2453_v36 }
 0x322   : > { %vm1027_vm5 = vmor %vm1025_vm4, %vm1026_vm3 }
 0x323   : > { %v1021_v52 = vmul.f32 %v2453_v36, %v1020_v59 }
 0x325   : > { %v1022_v53 = vmul.f32 0.5, %v1021_v52 }
 0x327   : > { %v1023_v56 = vsub.f32 1.5, %v1022_v53 }
 0x329   : > { %v1024_v62 = vmul.f32 %v2453_v36, %v1023_v56 }
 0x32b   : > { %v1028_v0 = vsel %vm1027_vm5, %v2453_v36, %v1024_v62  ;;  %v2239_v62 = vunpack.c.l.bf16 %v2160_v15 }
 0x32c   : > { %v1030_v48 = vrot.slane %v1028_v0, 1  ;;  %v2244_v0 = vunpack.c.h.bf16 %v2165_v17 }
 0x32e   : > { %v1032_v34 = vmul.f32 %v1030_v48, %v958_v50  ;;  %v2243_v50 = vunpack.c.l.bf16 %v2165_v17  ;;  %v2175_v48 = vpack.c.bf16 %v2740_v1, %v2738_v60  ;;  %v2248_v17 = vunpack.c.h.bf16 %v2990_v16 }
 0x330   : > { %v1033_v4 = vmul.f32 %v1032_v34, %v961_v35  ;;  %v1035_v5 = vmul.f32 %v1034_v21, %v1032_v34 }
 0x332   : > { %v1036_v11 = vadd.f32 %v1035_v5, %v959_v20  ;;  %v2982_v14 = vperm.slane %v1033_v4, 0 }
 0x334   : > { %v1037_v22 = vmul.f32 %v1036_v11, %v961_v35  ;;  %v1112_v49 = vmul.f32 %v2255_v7, %v2982_v14  ;;  %v1113_v54 = vmul.f32 %v2256_v63, %v2982_v14  ;;  %v1114_v24 = vmul.f32 %v2259_v19, %v2982_v14 }
 0x335   : > { %v1115_v23 = vmul.f32 %v2260_v51, %v2982_v14  ;;  %v1116_v25 = vmul.f32 %v2263_v61, %v2982_v14  ;;  %v1117_v9 = vmul.f32 %v2264_v28, %v2982_v14  ;;  %v1118_v29 = vmul.f32 %v2267_v27, %v2982_v14 }
 0x336   : > { %v1038_v40 = vadd.f32 %v1037_v22, %v962_v32  ;;  %v1119_v31 = vmul.f32 %v2268_v38, %v2982_v14  ;;  %v1128_v46 = vmul.f32 %v2287_v43, %v2982_v14  ;;  %v1129_v47 = vmul.f32 %v2288_v6, %v2982_v14 }
 0x337   : > { %v1130_v36 = vmul.f32 %v2291_v55, %v2982_v14  ;;  %v1131_v59 = vmul.f32 %v2292_v37, %v2982_v14  ;;  %v1132_v52 = vmul.f32 %v2295_v39, %v2982_v14  ;;  %v1133_v12 = vmul.f32 %v2296_v41, %v2982_v14 }
 0x338   : > { %v1134_v53 = vmul.f32 %v2299_v44, %v2982_v14  ;;  %v1135_v30 = vmul.f32 %v2300_v45, %v2982_v14  ;;  %v3021_v56 = vperm.slane %v1038_v40, 0  ;;  %v2247_v35 = vunpack.c.l.bf16 %v2990_v16 }
 0x339   : > { %v1104_v34 = vmul.f32 %v2239_v62, %v2982_v14  ;;  %v1105_v21 = vmul.f32 %v2240_v58, %v2982_v14  ;;  %v1106_v20 = vmul.f32 %v2243_v50, %v2982_v14  ;;  %v2251_v7 = vunpack.c.l.bf16 %v2175_v48 }
 0x33a   : > { %v3030_v3 = vadd.f32 %v3021_v56, %v1112_v49  ;;  %v3033_v4 = vadd.f32 %v3021_v56, %v1113_v54  ;;  %v3036_v5 = vadd.f32 %v3021_v56, %v1114_v24  ;;  %v3039_v10 = vadd.f32 %v3021_v56, %v1115_v23 }
 0x33b   : > { %v3042_v60 = vadd.f32 %v3021_v56, %v1116_v25  ;;  %v3045_v1 = vadd.f32 %v3021_v56, %v1117_v9  ;;  %v3048_v11 = vadd.f32 %v3021_v56, %v1118_v29  ;;  %v3051_v15 = vadd.f32 %v3021_v56, %v1119_v31 }
 0x33c   : > { %4362 = vst [vmem:[#allocation3_spill] sm:$0xff] %v3030_v3  ;;  %v1107_v63 = vmul.f32 %v2244_v0, %v2982_v14  ;;  %v1108_v19 = vmul.f32 %v2247_v35, %v2982_v14  ;;  %v3057_v22 = vadd.f32 %v3021_v56, %v1104_v34  ;;  %v3060_v51 = vadd.f32 %v3021_v56, %v1105_v21 }
 0x33d   : > { %4363 = vst [vmem:[#allocation4_spill] sm:$0xff] %v3033_v4  ;;  %v3063_v61 = vadd.f32 %v3021_v56, %v1106_v20  ;;  %v3066_v28 = vadd.f32 %v3021_v56, %v1128_v46  ;;  %v3069_v27 = vadd.f32 %v3021_v56, %v1129_v47  ;;  %v3072_v16 = vadd.f32 %v3021_v56, %v1130_v36 }
 0x33e   : > { %4364 = vst [vmem:[#allocation5_spill] sm:$0xff] %v3036_v5  ;;  %v3075_v32 = vadd.f32 %v3021_v56, %v1131_v59  ;;  %v3078_v38 = vadd.f32 %v3021_v56, %v1132_v52  ;;  %v3081_v43 = vadd.f32 %v3021_v56, %v1133_v12  ;;  %v3084_v49 = vadd.f32 %v3021_v56, %v1134_v53 }
 0x33f   : > { %4365 = vst [vmem:[#allocation6_spill] sm:$0xff] %v3039_v10  ;;  %v3087_v54 = vadd.f32 %v3021_v56, %v1135_v30  ;;  %v2252_v24 = vunpack.c.h.bf16 %v2175_v48  ;;  %v1109_v23 = vmul.f32 %v2248_v17, %v2982_v14  ;;  %v3091_v25 = vadd.f32 %v3021_v56, %v1107_v63 }
 0x340   : > { %4366 = vst [vmem:[#allocation7_spill] sm:$0xff] %v3042_v60  ;;  %v1110_v9 = vmul.f32 %v2251_v7, %v2982_v14  ;;  %v3095_v6 = vadd.f32 %v3021_v56, %v1108_v19  ;;  %v2101_v40 = vmul.f32 -1.442695, %v3057_v22  ;;  %v2102_v55 = vmul.f32 -1.442695, %v3060_v51 }
 0x341   : > { %4367 = vst [vmem:[#allocation8_spill] sm:$0xff] %v3045_v1  ;;  %v1111_v29 = vmul.f32 %v2252_v24, %v2982_v14  ;;  %v3100_v31 = vadd.f32 %v3021_v56, %v1109_v23  ;;  %v2103_v39 = vmul.f32 -1.442695, %v3063_v61  ;;  %v2200_v41 = vpack.c.bf16 %v2795_v2, %v2787_v57 }
 0x342   : > { %4368 = vst [vmem:[#allocation9_spill] sm:$0xff] %v3048_v11  ;;  %v3104_v37 = vadd.f32 %v3021_v56, %v1110_v9  ;;  %v2104_v45 = vmul.f32 -1.442695, %v3091_v25  ;;  %v2205_v46 = vpack.c.bf16 %v2807_v13, %v2801_v8  ;;  %2454 = vpow2.f32 %v2101_v40 }
 0x343   : > { %4369 = vst [vmem:[#allocation10_spill] sm:$0xff] %v3051_v15  ;;  %v3110_v44 = vadd.f32 %v3021_v56, %v1111_v29  ;;  %v2105_v47 = vmul.f32 -1.442695, %v3095_v6  ;;  %v2210_v36 = vpack.c.bf16 %v2812_v26, %v2810_v18  ;;  %2456 = vpow2.f32 %v2102_v55 }
 0x344   : > { %4370 = vst [vmem:[#allocation11_spill] sm:$0xff] %v3057_v22  ;;  %v2106_v59 = vmul.f32 -1.442695, %v3100_v31  ;;  %v2215_v57 = vpack.c.bf16 %v2816_v42, %v2814_v33  ;;  %2458 = vpow2.f32 %v2103_v39  ;;  %v2107_v2 = vmul.f32 -1.442695, %v3104_v37 }
 0x345   : > { %4371 = vst [vmem:[#allocation12_spill] sm:$0xff] %v3060_v51  ;;  %v2271_v52 = vunpack.c.l.bf16 %v2200_v41  ;;  %v2272_v12 = vunpack.c.h.bf16 %v2200_v41  ;;  %2460 = vpow2.f32 %v2104_v45  ;;  %v2108_v8 = vmul.f32 -1.442695, %v3110_v44 }
 0x346   : > { %4372 = vst [vmem:[#allocation13_spill] sm:$0xff] %v3063_v61  ;;  %v2275_v13 = vunpack.c.l.bf16 %v2205_v46  ;;  %v2276_v53 = vunpack.c.h.bf16 %v2205_v46  ;;  %2462 = vpow2.f32 %v2105_v47  ;;  %v2109_v30 = vmul.f32 -1.442695, %v3030_v3 }
 0x347   : > { %4373 = vst [vmem:[#allocation14_spill] sm:$0xff] %v3066_v28  ;;  %v2279_v18 = vunpack.c.l.bf16 %v2210_v36  ;;  %v2280_v26 = vunpack.c.h.bf16 %v2210_v36  ;;  %2464 = vpow2.f32 %v2106_v59  ;;  %v2110_v62 = vmul.f32 -1.442695, %v3033_v4 }
 0x348   : > { %4374 = vst [vmem:[#allocation15_spill] sm:$0xff] %v3069_v27  ;;  %v2455_v58 = vpop.eup %2454  ;;  %v2283_v33 = vunpack.c.l.bf16 %v2215_v57  ;;  %v1120_v42 = vmul.f32 %v2271_v52, %v2982_v14  ;;  %2466 = vpow2.f32 %v2107_v2  ;;  %v2111_v50 = vmul.f32 -1.442695, %v3036_v5 }
 0x349   : > { %4375 = vst [vmem:[#allocation16_spill] sm:$0xff] %v3072_v16  ;;  %v2457_v0 = vpop.eup %2456  ;;  %v2284_v48 = vunpack.c.h.bf16 %v2215_v57  ;;  %v1121_v35 = vmul.f32 %v2272_v12, %v2982_v14  ;;  %2468 = vpow2.f32 %v2108_v8  ;;  %v2112_v34 = vmul.f32 -1.442695, %v3039_v10 }
 0x34a   : > { %4376 = vst [vmem:[#allocation17_spill] sm:$0xff] %v3075_v32  ;;  %v3129_v21 = vpop.eup %2458  ;;  %v1122_v20 = vmul.f32 %v2275_v13, %v2982_v14  ;;  %v3133_v17 = vadd.f32 %v3021_v56, %v1120_v42  ;;  %2470 = vpow2.f32 %v2109_v30  ;;  %v2113_v7 = vmul.f32 -1.442695, %v3042_v60 }
 0x34b   : > { %4377 = vst [vmem:[#allocation18_spill] sm:$0xff] %v3078_v38  ;;  %v3136_v63 = vpop.eup %2460  ;;  %v1123_v19 = vmul.f32 %v2276_v53, %v2982_v14  ;;  %v3140_v24 = vadd.f32 %v3021_v56, %v1121_v35  ;;  %2472 = vpow2.f32 %v2110_v62  ;;  %v2114_v23 = vmul.f32 -1.442695, %v3045_v1 }
 0x34c   : > { %4378 = vst [vmem:[#allocation19_spill] sm:$0xff] %v3081_v43  ;;  %v3143_v9 = vpop.eup %2462  ;;  %v1124_v40 = vmul.f32 %v2279_v18, %v2982_v14  ;;  %v3147_v29 = vadd.f32 %v3021_v56, %v1122_v20  ;;  %2474 = vpow2.f32 %v2111_v50  ;;  %v2115_v55 = vmul.f32 -1.442695, %v3048_v11 }
 0x34d   : > { %4379 = vst [vmem:[#allocation20_spill] sm:$0xff] %v3084_v49  ;;  %v3150_v39 = vpop.eup %2464  ;;  %v1125_v41 = vmul.f32 %v2280_v26, %v2982_v14  ;;  %v3154_v45 = vadd.f32 %v3021_v56, %v1123_v19  ;;  %2476 = vpow2.f32 %v2112_v34  ;;  %v2116_v46 = vmul.f32 -1.442695, %v3051_v15 }
 0x34e   : > { %4380 = vst [vmem:[#allocation21_spill] sm:$0xff] %v3087_v54  ;;  %v2467_v47 = vpop.eup %2466  ;;  %v1126_v36 = vmul.f32 %v2283_v33, %v2982_v14  ;;  %v3159_v59 = vadd.f32 %v3021_v56, %v1124_v40  ;;  %2478 = vpow2.f32 %v2113_v7  ;;  %v2117_v57 = vmul.f32 -1.442695, %v3133_v17 }
 0x34f   : > { %4381 = vst [vmem:[#allocation22_spill] sm:$0xff] %v3091_v25  ;;  %v2469_v2 = vpop.eup %2468  ;;  %v1127_v52 = vmul.f32 %v2284_v48, %v2982_v14  ;;  %v3164_v12 = vadd.f32 %v3021_v56, %v1125_v41  ;;  %2480 = vpow2.f32 %v2114_v23  ;;  %v2118_v8 = vmul.f32 -1.442695, %v3140_v24 }
 0x350   : > { %4382 = vst [vmem:[#allocation23_spill] sm:$0xff] %v3095_v6  ;;  %v2471_v13 = vpop.eup %2470  ;;  %v3168_v53 = vadd.f32 %v3021_v56, %v1126_v36  ;;  %2482 = vpow2.f32 %v2115_v55  ;;  %v2119_v30 = vmul.f32 -1.442695, %v3147_v29  ;;  %v2120_v14 = vmul.f32 -1.442695, %v3154_v45 }
 0x351   : > { %4383 = vst [vmem:[#allocation24_spill] sm:$0xff] %v3100_v31  ;;  %v2473_v18 = vpop.eup %2472  ;;  %v3172_v26 = vadd.f32 %v3021_v56, %v1127_v52  ;;  %2484 = vpow2.f32 %v2116_v46  ;;  %v2121_v33 = vmul.f32 -1.442695, %v3159_v59  ;;  %v2122_v50 = vmul.f32 -1.442695, %v3164_v12 }
 0x352   : > { %4384 = vst [vmem:[#allocation25_spill] sm:$0xff] %v3104_v37  ;;  %v2475_v62 = vpop.eup %2474  ;;  %2486 = vpow2.f32 %v2117_v57  ;;  %v2123_v35 = vmul.f32 -1.442695, %v3168_v53  ;;  %v3179_v20 = vadd.f32 1.0, %v2455_v58  ;;  %v2125_v19 = vmul.f32 -1.442695, %v3066_v28 }
 0x353   : > { %4385 = vst [vmem:[#allocation26_spill] sm:$0xff] %v3110_v44  ;;  %v2477_v42 = vpop.eup %2476  ;;  %2488 = vpow2.f32 %v2118_v8  ;;  %v2124_v56 = vmul.f32 -1.442695, %v3172_v26  ;;  %v3182_v23 = vadd.f32 1.0, %v2457_v0  ;;  %v2126_v55 = vmul.f32 -1.442695, %v3069_v27 }
 0x354   : > { %4386 = vst [vmem:[#allocation27_spill] sm:$0xff] %v3133_v17  ;;  %v2479_v48 = vpop.eup %2478  ;;  %2490 = vpow2.f32 %v2119_v30  ;;  %v2127_v46 = vmul.f32 -1.442695, %v3072_v16  ;;  %v2128_v36 = vmul.f32 -1.442695, %v3075_v32  ;;  %v3190_v8 = vadd.f32 1.0, %v3129_v21 }
 0x355   : > { %4387 = vst [vmem:[#allocation28_spill] sm:$0xff] %v3140_v24  ;;  %v2481_v34 = vpop.eup %2480  ;;  %2492 = vpow2.f32 %v2120_v14  ;;  %v2129_v57 = vmul.f32 -1.442695, %v3078_v38  ;;  %v2130_v52 = vmul.f32 -1.442695, %v3081_v43  ;;  %v1308_v0 = vand.u32 2147483648, %v3179_v20 }
 0x356   : > { %4388 = vst [vmem:[#allocation29_spill] sm:$0xff] %v3147_v29  ;;  %v2483_v7 = vpop.eup %2482  ;;  %2494 = vpow2.f32 %v2121_v33  ;;  %v3194_v14 = vmul.f32 -1.442695, %v3084_v49  ;;  %v3197_v33 = vadd.f32 1.0, %v3136_v63  ;;  %v3204_v21 = vadd.f32 1.0, %v3143_v9 }
 0x357   : > { %4389 = vst [vmem:[#allocation30_spill] sm:$0xff] %v3154_v45  ;;  %v2485_v40 = vpop.eup %2484  ;;  %2496 = vpow2.f32 %v2122_v50  ;;  %v1323_v50 = vand.u32 2147483648, %v3182_v23  ;;  %v3215_v45 = vor.u32 1.1754944e-38, %v1308_v0  ;;  %v1338_v9 = vand.u32 2147483648, %v3190_v8 }
 0x358   : > { %4390 = vst [vmem:[#allocation31_spill] sm:$0xff] %v3159_v59  ;;  %v2487_v41 = vpop.eup %2486  ;;  %2498 = vpow2.f32 %v2123_v35  ;;  %v3223_v24 = vadd.f32 1.0, %v2473_v18  ;;  %v3225_v63 = vadd.f32 1.0, %v2475_v62  ;;  %v3229_v0 = vadd.f32 1.0, %v2477_v42 }
 0x359   : > { %4391 = vst [vmem:[#allocation32_spill] sm:$0xff] %v3164_v12  ;;  %v2489_v58 = vpop.eup %2488  ;;  %2500 = vpow2.f32 %v2124_v56  ;;  %v3201_v56 = vmul.f32 -1.442695, %v3087_v54  ;;  %v3210_v12 = vadd.f32 1.0, %v2467_v47  ;;  %v3234_v54 = vadd.f32 1.0, %v2479_v48 }
 0x35a   : > { %4392 = vst [vmem:[#allocation33_spill] sm:$0xff] %v3168_v53  ;;  %v2491_v30 = vpop.eup %2490  ;;  %2502 = vpow2.f32 %v2125_v19  ;;  %v3208_v19 = vadd.f32 1.0, %v3150_v39  ;;  %v1353_v39 = vand.u32 2147483648, %v3197_v33  ;;  %v3237_v18 = vor.u32 1.1754944e-38, %v1338_v9 }
 0x35b   : > { %4393 = vst [vmem:[#allocation34_spill] sm:$0xff] %v3172_v26  ;;  %v2493_v35 = vpop.eup %2492  ;;  %2504 = vpow2.f32 %v2126_v55  ;;  %v3213_v55 = vadd.f32 1.0, %v2469_v2  ;;  %v3218_v26 = vadd.f32 1.0, %v2471_v13  ;;  %v3240_v2 = vadd.f32 1.0, %v2481_v34 }
 0x35c   : > { %v2495_v53 = vpop.eup %2494  ;;  %2506 = vpow2.f32 %v2127_v46  ;;  %v3220_v46 = vor.u32 1.1754944e-38, %v1323_v50  ;;  %v1383_v62 = vand.u32 2147483648, %v3208_v19  ;;  %v3242_v42 = vor.u32 1.1754944e-38, %v1353_v39 }
 0x35d   : > { %v2497_v59 = vpop.eup %2496  ;;  %2508 = vpow2.f32 %v2128_v36  ;;  %v3245_v38 = vadd.f32 1.0, %v2483_v7  ;;  %v3247_v32 = vadd.f32 1.0, %v2485_v40  ;;  %v3251_v16 = vadd.f32 1.0, %v2487_v41 }
 0x35e   : > { %v2499_v29 = vpop.eup %2498  ;;  %2510 = vpow2.f32 %v2129_v57  ;;  %v1368_v57 = vand.u32 2147483648, %v3204_v21  ;;  %v3259_v43 = vadd.f32 1.0, %v2489_v58  ;;  %v3261_v7 = vadd.f32 1.0, %v2491_v30 }
 0x35f   : > { %v2501_v47 = vpop.eup %2500  ;;  %2512 = vrcp.f32 %v3179_v20  ;;  %v3264_v40 = vor.u32 1.1754944e-38, %v1383_v62  ;;  %v3268_v41 = vadd.f32 1.0, %v2493_v35  ;;  %v1413_v27 = vand.u32 2147483648, %v3213_v55 }
 0x360   : > { %v2503_v36 = vpop.eup %2502  ;;  %2514 = vrcp.f32 %v3182_v23  ;;  %v3254_v34 = vor.u32 1.1754944e-38, %v1368_v57  ;;  %v3276_v58 = vadd.f32 1.0, %v2495_v53  ;;  %v3278_v30 = vadd.f32 1.0, %v2497_v59 }
 0x361   : > { %v2505_v50 = vpop.eup %2504  ;;  %2516 = vrcp.f32 %v3190_v8  ;;  %v3282_v35 = vadd.f32 1.0, %v2499_v29  ;;  %v3290_v1 = vadd.f32 1.0, %v2501_v47  ;;  %v1428_v53 = vand.u32 2147483648, %v3218_v26 }
 0x362   : > { %v2507_v49 = vpop.eup %2506  ;;  %2518 = vpow2.f32 %v2130_v52  ;;  %v1398_v52 = vand.u32 2147483648, %v3210_v12  ;;  %4394 = vst [vmem:[#allocation35_spill] sm:$0xff] %v3276_v58  ;;  %v3306_v62 = vadd.f32 1.0, %v2503_v36  ;;  %v3308_v60 = vadd.f32 1.0, %v2505_v50 }
 0x363   : > { %v2509_v13 = vpop.eup %2508  ;;  %2520 = vrcp.f32 %v3197_v33  ;;  %4395 = vst [vmem:[#allocation36_spill] sm:$0xff] %v3278_v30  ;;  %v1443_v10 = vand.u32 2147483648, %v3223_v24  ;;  %v3314_v4 = vadd.f32 1.0, %v2507_v49  ;;  %v3321_v50 = vor.u32 1.1754944e-38, %v1428_v53 }
 0x364   : > { %v2511_v9 = vpop.eup %2510  ;;  %2522 = vrcp.f32 %v3204_v21  ;;  %4396 = vst [vmem:[#allocation37_spill] sm:$0xff] %v3282_v35  ;;  %v3286_v15 = vor.u32 1.1754944e-38, %v1398_v52  ;;  %v3324_v6 = vadd.f32 1.0, %v2509_v13  ;;  %vm1302_vm6 = vweird.f32 %v3179_v20 }
 0x365   : > { %v3257_v39 = vpop.eup %2512  ;;  %2524 = vrcp.f32 %v3208_v19  ;;  %4397 = vst [vmem:[#allocation38_spill] sm:$0xff] %v3290_v1  ;;  %v3326_v49 = vadd.f32 1.0, %v2511_v9  ;;  %v1458_v25 = vand.u32 2147483648, %v3225_v63  ;;  %vm1317_vm7 = vweird.f32 %v3182_v23 }
 0x366   : > { %v3266_v48 = vpop.eup %2514  ;;  %2526 = vrcp.f32 %v3210_v12  ;;  %v1298_v57 = vmul.f32 %v3257_v39, %v3179_v20  ;;  %4398 = vst [vmem:[#allocation39_spill] sm:$0xff] %v3306_v62  ;;  %v3337_v61 = vor.u32 1.1754944e-38, %v1443_v10  ;;  %vm1332_vm8 = vweird.f32 %v3190_v8 }
 0x367   : > { %v3273_v28 = vpop.eup %2516  ;;  %2528 = vpow2.f32 %v3194_v14  ;;  %v1313_v59 = vmul.f32 %v3266_v48, %v3182_v23  ;;  %4399 = vst [vmem:[#allocation40_spill] sm:$0xff] %v3308_v60  ;;  %v1473_v13 = vand.u32 2147483648, %v3229_v0  ;;  %vm1347_vm10 = vweird.f32 %v3197_v33 }
 0x368   : > { %v2519_v17 = vpop.eup %2518  ;;  %2530 = vpow2.f32 %v3201_v56  ;;  %v1328_v29 = vmul.f32 %v3273_v28, %v3190_v8  ;;  %v3300_v56 = vor.u32 1.1754944e-38, %v1413_v27  ;;  %4400 = vst [vmem:[#allocation41_spill] sm:$0xff] %v3314_v4  ;;  %v1299_v27 = vsub.f32 1.0, %v1298_v57 }
 0x369   : > { %v3288_v11 = vpop.eup %2520  ;;  %2532 = vrcp.f32 %v3213_v55  ;;  %v1314_v37 = vsub.f32 1.0, %v1313_v59  ;;  %4401 = vst [vmem:[#allocation42_spill] sm:$0xff] %v3324_v6  ;;  %v3342_v51 = vadd.f32 1.0, %v2519_v17  ;;  %v4406_v17 = vand.u32 2147483647, %v3179_v20 }
 0x36a   : > { %v3296_v14 = vpop.eup %2522  ;;  %2534 = vrcp.f32 %v3218_v26  ;;  %v1343_v3 = vmul.f32 %v3288_v11, %v3197_v33  ;;  %4402 = vst [vmem:[#allocation43_spill] sm:$0xff] %v3326_v49  ;;  %v1329_v57 = vsub.f32 1.0, %v1328_v29  ;;  %v1300_v22 = vmul.f32 %v3257_v39, %v1299_v27 }
 0x36b   : > { %v3304_v47 = vpop.eup %2524  ;;  %2536 = vrcp.f32 %v3223_v24  ;;  %v1358_v36 = vmul.f32 %v3296_v14, %v3204_v21  ;;  %4403 = vst [vmem:[#allocation44_spill] sm:$0xff] %v3342_v51  ;;  %v1315_v4 = vmul.f32 %v3266_v48, %v1314_v37  ;;  %vm3357_vm9 = vcmp.eq.f32.partialorder %v4406_v17, 8.507059e+37 }
 0x36c   : > { %v3312_v5 = vpop.eup %2526  ;;  %2538 = vrcp.f32 %v3225_v63  ;;  %v1373_v59 = vmul.f32 %v3304_v47, %v3208_v19  ;;  %v1344_v49 = vsub.f32 1.0, %v1343_v3  ;;  %v1330_v27 = vmul.f32 %v3273_v28, %v1329_v57 }
 0x36d   : > { %v2529_v44 = vpop.eup %2528  ;;  %v1388_v53 = vmul.f32 %v3312_v5, %v3210_v12  ;;  %v1359_v60 = vsub.f32 1.0, %v1358_v36  ;;  %v3365_v37 = vor.u32 1.1754944e-38, %v1458_v25  ;;  %vm1303_vm11 = vweird.f32 %v3257_v39 }
 0x36e   : > { %v2531_v31 = vpop.eup %2530  ;;  %v3344_v29 = vadd.f32 1.0, %v2529_v44  ;;  %vm1318_vm12 = vweird.f32 %v3266_v48  ;;  %vm1362_vm13 = vweird.f32 %v3204_v21  ;;  %v1301_v10 = vadd.f32 %v3257_v39, %v1300_v22  ;;  %vm3411_vm4 = vmor %vm1302_vm6, %vm1303_vm11 }
 0x36f   : > { %v3330_v52 = vpop.eup %2532  ;;  %v3353_v62 = vadd.f32 1.0, %v2531_v31  ;;  %v1374_v31 = vsub.f32 1.0, %v1373_v59  ;;  %v1389_v17 = vsub.f32 1.0, %v1388_v53  ;;  %v4409_v57 = vand.u32 2147483647, %v3182_v23  ;;  %vm3426_vm6 = vmor %vm1317_vm7, %vm1318_vm12 }
 0x370   : > { %v3340_v9 = vpop.eup %2534  ;;  %4404 = vst [vmem:[#allocation45_spill] sm:$0xff] %v3344_v29  ;;  %v1403_v3 = vmul.f32 %v3330_v52, %v3213_v55  ;;  %v4412_v25 = vand.u32 2147483647, %v3190_v8  ;;  %v1345_v51 = vmul.f32 %v3288_v11, %v1344_v49  ;;  %v1316_v53 = vadd.f32 %v3266_v48, %v1315_v4 }
 0x371   : > { %v3348_v6 = vpop.eup %2536  ;;  %4405 = vst [vmem:[#allocation46_spill] sm:$0xff] %v3353_v62  ;;  %vm3375_vm14 = vcmp.eq.f32.partialorder %v4409_v57, 8.507059e+37  ;;  %v1418_v59 = vmul.f32 %v3340_v9, %v3218_v26  ;;  %vm1333_vm1 = vweird.f32 %v3273_v28  ;;  %v1360_v57 = vmul.f32 %v3296_v14, %v1359_v60 }
 0x372   : > { %v3367_v36 = vpop.eup %2538  ;;  %vm3381_vm15 = vcmp.eq.f32.partialorder %v4412_v25, 8.507059e+37  ;;  %v1433_v22 = vmul.f32 %v3348_v6, %v3223_v24  ;;  %v3395_v25 = vor.u32 1.1754944e-38, %v1473_v13  ;;  %v1331_v49 = vadd.f32 %v3273_v28, %v1330_v27  ;;  %vm3442_vm7 = vmor %vm1332_vm8, %vm1333_vm1 }
 0x373   : > { %v4415_v1 = vand.u32 2147483647, %v3197_v33  ;;  %v1404_v30 = vsub.f32 1.0, %v1403_v3  ;;  %v1448_v4 = vmul.f32 %v3367_v36, %v3225_v63  ;;  %2540 = vrcp.f32 %v3229_v0 }
 0x374   : > { %vm1348_vm5 = vweird.f32 %v3288_v11  ;;  %v1390_v13 = vmul.f32 %v3312_v5, %v1389_v17  ;;  %2542 = vrcp.f32 %v3234_v54  ;;  %v1305_v27 = vsel %vm3411_vm4, %v3257_v39, %v1301_v10 }
 0x375   : > { %vm3400_vm3 = vcmp.eq.f32.partialorder %v4415_v1, 8.507059e+37  ;;  %v1375_v1 = vmul.f32 %v3304_v47, %v1374_v31  ;;  %v1346_v3 = vadd.f32 %v3288_v11, %v1345_v51  ;;  %v4422_v31 = vand.u32 2147483647, %v3204_v21 }
 0x376   : > { %vm1407_vm2 = vweird.f32 %v3213_v55  ;;  %v1419_v60 = vsub.f32 1.0, %v1418_v59  ;;  %v1434_v39 = vsub.f32 1.0, %v1433_v22  ;;  %v1361_v51 = vadd.f32 %v3296_v14, %v1360_v57 }
 0x377   : > { %vm3433_vm11 = vcmp.eq.f32.partialorder %v4422_v31, 8.507059e+37  ;;  %vm1363_vm12 = vweird.f32 %v3296_v14  ;;  %vm1378_vm4 = vweird.f32 %v3304_v47  ;;  %vm1422_vm0 = vweird.f32 %v3218_v26 }
 0x378   : > { %2544 = vrcp.f32 %v3240_v2  ;;  %v1320_v10 = vsel %vm3426_vm6, %v3266_v48, %v1316_v53  ;;  %v1335_v8 = vsel %vm3442_vm7, %v3273_v28, %v1331_v49  ;;  %v4427_v59 = vand.u32 2147483647, %v3208_v19  ;;  %vm3480_vm7 = vmor %vm1347_vm10, %vm1348_vm5 }
 0x379   : > { %v4430_v57 = vand.u32 2147483647, %v3210_v12  ;;  %v1405_v58 = vmul.f32 %v3330_v52, %v1404_v30  ;;  %v1449_v48 = vsub.f32 1.0, %v1448_v4  ;;  %v3474_v28 = vsel %vm3357_vm9, %v3215_v45, %v1305_v27  ;;  %v3487_v4 = vpop.eup %2540  ;;  %vm3496_vm9 = vmor %vm1362_vm13, %vm1363_vm12 }
 0x37a   : > { %vm3459_vm8 = vcmp.eq.f32.partialorder %v4427_v59, 8.507059e+37  ;;  %v1376_v49 = vadd.f32 %v3304_v47, %v1375_v1  ;;  %v1391_v30 = vadd.f32 %v3312_v5, %v1390_v13  ;;  %vm1393_vm6 = vweird.f32 %v3312_v5 }
 0x37b   : > { %vm3465_vm1 = vcmp.eq.f32.partialorder %v4430_v57, 8.507059e+37  ;;  %v1350_v45 = vsel %vm3480_vm7, %v3288_v11, %v1346_v3  ;;  %v4437_v44 = vand.u32 2147483647, %v3213_v55  ;;  %v1420_v13 = vmul.f32 %v3340_v9, %v1419_v60  ;;  %v3510_v11 = vpop.eup %2542 }
 0x37c   : > { %v1435_v27 = vmul.f32 %v3348_v6, %v1434_v39  ;;  %vm1452_vm5 = vweird.f32 %v3225_v63  ;;  %2546 = vrcp.f32 %v3245_v38  ;;  %v3515_v21 = vsel %vm3375_vm14, %v3220_v46, %v1320_v10 }
 0x37d   : > { %vm3502_vm10 = vcmp.eq.f32.partialorder %v4437_v44, 8.507059e+37  ;;  %v3520_v20 = vsel %vm3381_vm15, %v3237_v18, %v1335_v8  ;;  %v1365_v3 = vsel %vm3496_vm9, %v3296_v14, %v1361_v51  ;;  %vm4440_vm13 = vweird.f32 %v3208_v19 }
 0x37e   : > { %vm3529_vm12 = vmor %vm4440_vm13, %vm1378_vm4  ;;  %v1463_v46 = vmul.f32 %v3487_v4, %v3229_v0  ;;  %vm4443_vm14 = vweird.f32 %v3210_v12  ;;  %v1406_v62 = vadd.f32 %v3330_v52, %v1405_v58  ;;  %vm1408_vm7 = vweird.f32 %v3330_v52  ;;  %v3560_v58 = vpop.eup %2544 }
 0x37f   : > { %vm3539_vm15 = vmor %vm4443_vm14, %vm1393_vm6  ;;  %v4446_v19 = vand.u32 2147483647, %v3218_v26  ;;  %v4449_v29 = vand.u32 2147483647, %v3223_v24  ;;  %v1450_v12 = vmul.f32 %v3367_v36, %v1449_v48  ;;  %v1478_v23 = vmul.f32 %v3510_v11, %v3234_v54 }
 0x380   : > { %v3565_v51 = vsel %vm3400_vm3, %v3242_v42, %v1350_v45  ;;  %v1380_v10 = vsel %vm3529_vm12, %v3304_v47, %v1376_v49  ;;  %v1395_v8 = vsel %vm3539_vm15, %v3312_v5, %v1391_v30  ;;  %vm1423_vm6 = vweird.f32 %v3340_v9  ;;  %vm3594_vm12 = vmor %vm1407_vm2, %vm1408_vm7 }
 0x381   : > { %vm3547_vm4 = vcmp.eq.f32.partialorder %v4446_v19, 8.507059e+37  ;;  %vm3553_vm9 = vcmp.eq.f32.partialorder %v4449_v29, 8.507059e+37  ;;  %v1421_v59 = vadd.f32 %v3340_v9, %v1420_v13  ;;  %v1436_v57 = vadd.f32 %v3348_v6, %v1435_v27 }
 0x382   : > { %vm1438_vm13 = vweird.f32 %v3348_v6  ;;  %v4452_v35 = vand.u32 2147483647, %v3225_v63  ;;  %v1493_v47 = vmul.f32 %v3560_v58, %v3240_v2  ;;  %v3588_v5 = vsel %vm3433_vm11, %v3254_v34, %v1365_v3  ;;  %v3600_v49 = vpop.eup %2546  ;;  %vm3607_vm11 = vmor %vm1422_vm0, %vm1423_vm6 }
 0x383   : > { %vm1453_vm14 = vweird.f32 %v3367_v36  ;;  %v1464_v53 = vsub.f32 1.0, %v1463_v46  ;;  %2548 = vrcp.f32 %v3247_v32  ;;  %v1410_v34 = vsel %vm3594_vm12, %v3330_v52, %v1406_v62 }
 0x384   : > { %vm3579_vm3 = vcmp.eq.f32.partialorder %v4452_v35, 8.507059e+37  ;;  %v1451_v55 = vadd.f32 %v3367_v36, %v1450_v12  ;;  %v1479_v30 = vsub.f32 1.0, %v1478_v23  ;;  %v1488_v45 = vand.u32 2147483648, %v3234_v54 }
 0x385   : > { %v3616_v33 = vsel %vm3459_vm8, %v3264_v40, %v1380_v10  ;;  %v3621_v52 = vsel %vm3465_vm1, %v3286_v15, %v1395_v8  ;;  %vm4459_vm0 = vweird.f32 %v3223_v24  ;;  %vm1467_vm15 = vweird.f32 %v3229_v0  ;;  %vm3652_vm1 = vmor %vm1452_vm5, %vm1453_vm14 }
 0x386   : > { %vm3627_vm2 = vmor %vm4459_vm0, %vm1438_vm13  ;;  %v1494_v44 = vsub.f32 1.0, %v1493_v47  ;;  %v1508_v40 = vmul.f32 %v3600_v49, %v3245_v38  ;;  %v1425_v22 = vsel %vm3607_vm11, %v3340_v9, %v1421_v59  ;;  %vm1482_vm8 = vweird.f32 %v3234_v54 }
 0x387   : > { %v1440_v15 = vsel %vm3627_vm2, %v3348_v6, %v1436_v57  ;;  %v1486_v24 = vand.u32 2147483647, %v3234_v54  ;;  %2550 = vrcp.f32 %v3251_v16  ;;  %v3646_v31 = vsel %vm3502_vm10, %v3300_v56, %v1410_v34 }
 0x388   : > { %v1465_v6 = vmul.f32 %v3487_v4, %v1464_v53  ;;  %vm1497_vm7 = vweird.f32 %v3240_v2  ;;  %v1501_v13 = vand.u32 2147483647, %v3240_v2  ;;  %v1503_v27 = vand.u32 2147483648, %v3240_v2 }
 0x389   : > { %v1455_v56 = vsel %vm3652_vm1, %v3367_v36, %v1451_v55  ;;  %v1480_v1 = vmul.f32 %v3510_v11, %v1479_v30  ;;  %v1489_v3 = vor.u32 1.1754944e-38, %v1488_v45  ;;  %v1509_v63 = vsub.f32 1.0, %v1508_v40  ;;  %v3664_v60 = vpop.eup %2548 }
 0x38a   : > { %v3669_v46 = vsel %vm3547_vm4, %v3321_v50, %v1425_v22  ;;  %v3674_v18 = vsel %vm3553_vm9, %v3337_v61, %v1440_v15  ;;  %v4464_v62 = vand.u32 2147483647, %v3229_v0  ;;  %v1495_v19 = vmul.f32 %v3560_v58, %v1494_v44 }
 0x38b   : > { %2552 = vrcp.f32 %v3259_v43  ;;  %vm1468_vm5 = vweird.f32 %v3487_v4  ;;  %vm3685_vm6 = vcmp.eq.f32.partialorder %v1486_v24, 8.507059e+37  ;;  %v1516_v14 = vand.u32 2147483647, %v3245_v38 }
 0x38c   : > { %vm3678_vm10 = vcmp.eq.f32.partialorder %v4464_v62, 8.507059e+37  ;;  %v1518_v61 = vand.u32 2147483648, %v3245_v38  ;;  %v1523_v29 = vmul.f32 %v3664_v60, %v3247_v32  ;;  %v3696_v39 = vsel %vm3579_vm3, %v3365_v37, %v1455_v56  ;;  %vm3718_vm3 = vmor %vm1467_vm15, %vm1468_vm5 }
 0x38d   : > { %v1466_v12 = vadd.f32 %v3487_v4, %v1465_v6  ;;  %vm1483_vm4 = vweird.f32 %v3510_v11  ;;  %vm3700_vm9 = vcmp.eq.f32.partialorder %v1501_v13, 8.507059e+37  ;;  %v1504_v10 = vor.u32 1.1754944e-38, %v1503_v27  ;;  %v3704_v8 = vpop.eup %2550  ;;  %v4479_v13 = vld [vmem:[#allocation35_spill] sm:$0xff] }
 0x38e   : > { %v1481_v59 = vadd.f32 %v3510_v11, %v1480_v1  ;;  %vm1498_vm13 = vweird.f32 %v3560_v58  ;;  %v1510_v57 = vmul.f32 %v3600_v49, %v1509_v63  ;;  %2554 = vrcp.f32 %v3261_v7  ;;  %vm3737_vm11 = vmor %vm1482_vm8, %vm1483_vm4 }
 0x38f   : > { %v1496_v37 = vadd.f32 %v3560_v58, %v1495_v19  ;;  %v1524_v35 = vsub.f32 1.0, %v1523_v29  ;;  %v1533_v42 = vand.u32 2147483648, %v3247_v32  ;;  %v1538_v47 = vmul.f32 %v3704_v8, %v3251_v16  ;;  %vm3751_vm15 = vmor %vm1497_vm7, %vm1498_vm13 }
 0x390   : > { %vm1512_vm12 = vweird.f32 %v3245_v38  ;;  %vm3723_vm14 = vcmp.eq.f32.partialorder %v1516_v14, 8.507059e+37  ;;  %v1519_v34 = vor.u32 1.1754944e-38, %v1518_v61  ;;  %v1531_v17 = vand.u32 2147483647, %v3247_v32 }
 0x391   : > { %v3728_v55 = vpop.eup %2552  ;;  %v1470_v30 = vsel %vm3718_vm3, %v3487_v4, %v1466_v12  ;;  %vm1513_vm0 = vweird.f32 %v3600_v49  ;;  %vm1527_vm2 = vweird.f32 %v3247_v32  ;;  %v1539_v45 = vsub.f32 1.0, %v1538_v47 }
 0x392   : > { %2556 = vrcp.f32 %v3268_v41  ;;  %v1485_v26 = vsel %vm3737_vm11, %v3510_v11, %v1481_v59  ;;  %v1511_v4 = vadd.f32 %v3600_v49, %v1510_v57  ;;  %v1548_v44 = vand.u32 2147483648, %v3251_v16  ;;  %vm3782_vm1 = vmor %vm1512_vm12, %vm1513_vm0  ;;  %v4486_v57 = vld [vmem:[#allocation36_spill] sm:$0xff] }
 0x393   : > { %v1553_v40 = vmul.f32 %v3728_v55, %v3259_v43  ;;  %v1500_v22 = vsel %vm3751_vm15, %v3560_v58, %v1496_v37  ;;  %v1525_v11 = vmul.f32 %v3664_v60, %v1524_v35  ;;  %v1534_v15 = vor.u32 1.1754944e-38, %v1533_v42 }
 0x394   : > { %v1546_v2 = vand.u32 2147483647, %v3251_v16  ;;  %v3764_v24 = vpop.eup %2554  ;;  %v3769_v9 = vsel %vm3678_vm10, %v3395_v25, %v1470_v30  ;;  %v1540_v6 = vmul.f32 %v3704_v8, %v1539_v45  ;;  %vm1542_vm8 = vweird.f32 %v3251_v16 }
 0x395   : > { %2558 = vrcp.f32 %v4479_v13  ;;  %v3776_v58 = vsel %vm3685_vm6, %v1489_v3, %v1485_v26  ;;  %vm3786_vm7 = vcmp.eq.f32.partialorder %v1531_v17, 8.507059e+37  ;;  %v1554_v56 = vsub.f32 1.0, %v1553_v40  ;;  %v4495_v26 = vld [vmem:[#allocation37_spill] sm:$0xff] }
 0x396   : > { %v1563_v1 = vand.u32 2147483648, %v3259_v43  ;;  %v1568_v63 = vmul.f32 %v3764_v24, %v3261_v7  ;;  %v3795_v3 = vsel %vm3700_vm9, %v1504_v10, %v1500_v22  ;;  %v1515_v38 = vsel %vm3782_vm1, %v3600_v49, %v1511_v4 }
 0x397   : > { %vm1528_vm10 = vweird.f32 %v3664_v60  ;;  %v1549_v62 = vor.u32 1.1754944e-38, %v1548_v44  ;;  %v1526_v19 = vadd.f32 %v3664_v60, %v1525_v11  ;;  %vm1543_vm5 = vweird.f32 %v3704_v8 }
 0x398   : > { %v3801_v36 = vpop.eup %2556  ;;  %vm3805_vm6 = vcmp.eq.f32.partialorder %v1546_v2, 8.507059e+37  ;;  %vm1557_vm4 = vweird.f32 %v3259_v43  ;;  %v1561_v14 = vand.u32 2147483647, %v3259_v43  ;;  %v1569_v61 = vsub.f32 1.0, %v1568_v63  ;;  %vm3828_vm13 = vmor %vm1527_vm2, %vm1528_vm10 }
 0x399   : > { %v1541_v49 = vadd.f32 %v3704_v8, %v1540_v6  ;;  %vm1572_vm9 = vweird.f32 %v3261_v7  ;;  %v1576_v29 = vand.u32 2147483647, %v3261_v7  ;;  %v1583_v12 = vmul.f32 %v3801_v36, %v3268_v41  ;;  %vm3842_vm12 = vmor %vm1542_vm8, %vm1543_vm5 }
 0x39a   : > { %v3818_v23 = vsel %vm3723_vm14, %v1519_v34, %v1515_v38  ;;  %v1555_v10 = vmul.f32 %v3728_v55, %v1554_v56  ;;  %v1564_v59 = vor.u32 1.1754944e-38, %v1563_v1  ;;  %2560 = vrcp.f32 %v4486_v57  ;;  %v4498_v1 = vld [vmem:[#allocation38_spill] sm:$0xff] }
 0x39b   : > { %v3822_v37 = vpop.eup %2558  ;;  %vm1558_vm3 = vweird.f32 %v3728_v55  ;;  %v1570_v42 = vmul.f32 %v3764_v24, %v1569_v61  ;;  %v1578_v47 = vand.u32 2147483648, %v3261_v7  ;;  %v1584_v48 = vsub.f32 1.0, %v1583_v12  ;;  %v4505_v12 = vld [vmem:[#allocation39_spill] sm:$0xff] }
 0x39c   : > { %v1530_v53 = vsel %vm3828_vm13, %v3664_v60, %v1526_v19  ;;  %vm3846_vm14 = vcmp.eq.f32.partialorder %v1561_v14, 8.507059e+37  ;;  %vm1587_vm11 = vweird.f32 %v3268_v41  ;;  %v1591_v17 = vand.u32 2147483647, %v3268_v41  ;;  %vm3890_vm1 = vmor %vm1557_vm4, %vm1558_vm3 }
 0x39d   : > { %v1593_v30 = vand.u32 2147483648, %v3268_v41  ;;  %v1598_v60 = vmul.f32 %v3822_v37, %v4479_v13  ;;  %v1545_v16 = vsel %vm3842_vm12, %v3704_v8, %v1541_v49  ;;  %vm3858_vm0 = vcmp.eq.f32.partialorder %v1576_v29, 8.507059e+37 }
 0x39e   : > { %v1608_v45 = vand.u32 2147483648, %v4479_v13  ;;  %2562 = vrcp.f32 %v4495_v26  ;;  %v1556_v54 = vadd.f32 %v3728_v55, %v1555_v10  ;;  %v1585_v4 = vmul.f32 %v3801_v36, %v1584_v48 }
 0x39f   : > { %v1599_v44 = vsub.f32 1.0, %v1598_v60  ;;  %v1606_v40 = vand.u32 2147483647, %v4479_v13  ;;  %v3869_v22 = vsel %vm3786_vm7, %v1534_v15, %v1530_v53  ;;  %v1571_v8 = vadd.f32 %v3764_v24, %v1570_v42 }
 0x3a0   : > { %vm1573_vm2 = vweird.f32 %v3764_v24  ;;  %v1579_v11 = vor.u32 1.1754944e-38, %v1578_v47  ;;  %v3873_v2 = vpop.eup %2560  ;;  %vm3875_vm15 = vcmp.eq.f32.partialorder %v1591_v17, 8.507059e+37  ;;  %v1594_v27 = vor.u32 1.1754944e-38, %v1593_v30  ;;  %v4510_v17 = vld [vmem:[#allocation40_spill] sm:$0xff] }
 0x3a1   : > { %v1600_v56 = vmul.f32 %v3822_v37, %v1599_v44  ;;  %vm1602_vm8 = vweird.f32 %v4479_v13  ;;  %2564 = vrcp.f32 %v4498_v1  ;;  %v3884_v15 = vsel %vm3805_vm6, %v1549_v62, %v1545_v16  ;;  %vm3902_vm10 = vmor %vm1572_vm9, %vm1573_vm2  ;;  %v4513_v13 = vld [vmem:[#allocation41_spill] sm:$0xff] }
 0x3a2   : > { %vm1588_vm7 = vweird.f32 %v3801_v36  ;;  %v1609_v63 = vor.u32 1.1754944e-38, %v1608_v45  ;;  %v1613_v38 = vmul.f32 %v3873_v2, %v4486_v57  ;;  %v1560_v19 = vsel %vm3890_vm1, %v3728_v55, %v1556_v54 }
 0x3a3   : > { %v1586_v43 = vadd.f32 %v3801_v36, %v1585_v4  ;;  %vm3907_vm5 = vcmp.eq.f32.partialorder %v1606_v40, 8.507059e+37  ;;  %v1621_v14 = vand.u32 2147483647, %v4486_v57  ;;  %v1623_v61 = vand.u32 2147483648, %v4486_v57  ;;  %vm3933_vm9 = vmor %vm1587_vm11, %vm1588_vm7 }
 0x3a4   : > { %v3913_v49 = vpop.eup %2562  ;;  %v1575_v7 = vsel %vm3902_vm10, %v3764_v24, %v1571_v8  ;;  %v1614_v55 = vsub.f32 1.0, %v1613_v38  ;;  %v1638_v29 = vand.u32 2147483648, %v4495_v26  ;;  %2566 = vrcp.f32 %v4505_v12 }
 0x3a5   : > { %v1601_v10 = vadd.f32 %v3822_v37, %v1600_v56  ;;  %vm1603_vm6 = vweird.f32 %v3822_v37  ;;  %vm1617_vm4 = vweird.f32 %v4486_v57  ;;  %v1628_v35 = vmul.f32 %v3913_v49, %v4495_v26  ;;  %v4518_v57 = vld [vmem:[#allocation42_spill] sm:$0xff] }
 0x3a6   : > { %v3927_v42 = vsel %vm3846_vm14, %v1564_v59, %v1560_v19  ;;  %v1615_v47 = vmul.f32 %v3873_v2, %v1614_v55  ;;  %vm1632_vm13 = vweird.f32 %v4495_v26  ;;  %v1636_v48 = vand.u32 2147483647, %v4495_v26  ;;  %vm3956_vm12 = vmor %vm1602_vm8, %vm1603_vm6 }
 0x3a7   : > { %v3940_v53 = vpop.eup %2564  ;;  %v3944_v59 = vsel %vm3858_vm0, %v1579_v11, %v1575_v7  ;;  %v1590_v41 = vsel %vm3933_vm9, %v3801_v36, %v1586_v43  ;;  %vm3949_vm3 = vcmp.eq.f32.partialorder %v1621_v14, 8.507059e+37  ;;  %v1629_v34 = vsub.f32 1.0, %v1628_v35 }
 0x3a8   : > { %2568 = vrcp.f32 %v4510_v17  ;;  %vm1618_vm14 = vweird.f32 %v3873_v2  ;;  %v1624_v60 = vor.u32 1.1754944e-38, %v1623_v61  ;;  %v1639_v16 = vor.u32 1.1754944e-38, %v1638_v29 }
 0x3a9   : > { %v1643_v36 = vmul.f32 %v3940_v53, %v4498_v1  ;;  %v1605_v0 = vsel %vm3956_vm12, %v3822_v37, %v1601_v10  ;;  %v1616_v45 = vadd.f32 %v3873_v2, %v1615_v47  ;;  %v1630_v54 = vmul.f32 %v3913_v49, %v1629_v34 }
 0x3aa   : > { %vm1647_vm11 = vweird.f32 %v4498_v1  ;;  %2570 = vrcp.f32 %v4513_v13  ;;  %v3970_v4 = vpop.eup %2566  ;;  %v3974_v44 = vsel %vm3875_vm15, %v1594_v27, %v1590_v41  ;;  %vm3976_vm0 = vcmp.eq.f32.partialorder %v1636_v48, 8.507059e+37  ;;  %vm3996_vm15 = vmor %vm1617_vm4, %vm1618_vm14 }
 0x3ab   : > { %v1644_v8 = vsub.f32 1.0, %v1643_v36  ;;  %v1651_v37 = vand.u32 2147483647, %v4498_v1  ;;  %v1653_v11 = vand.u32 2147483648, %v4498_v1  ;;  %vm1633_vm2 = vweird.f32 %v3913_v49 }
 0x3ac   : > { %v1658_v56 = vmul.f32 %v3970_v4, %v4505_v12  ;;  %vm1662_vm8 = vweird.f32 %v4505_v12  ;;  %v1666_v6 = vand.u32 2147483647, %v4505_v12  ;;  %v1668_v27 = vand.u32 2147483648, %v4505_v12 }
 0x3ad   : > { %v3990_v25 = vsel %vm3907_vm5, %v1609_v63, %v1605_v0  ;;  %v1631_v19 = vadd.f32 %v3913_v49, %v1630_v54  ;;  %v1645_v62 = vmul.f32 %v3940_v53, %v1644_v8  ;;  %v1681_v43 = vand.u32 2147483647, %v4510_v17  ;;  %vm4024_vm5 = vmor %vm1632_vm13, %vm1633_vm2 }
 0x3ae   : > { %v4003_v14 = vpop.eup %2568  ;;  %v1620_v63 = vsel %vm3996_vm15, %v3873_v2, %v1616_v45  ;;  %v1659_v50 = vsub.f32 1.0, %v1658_v56  ;;  %v1683_v61 = vand.u32 2147483648, %v4510_v17  ;;  %2572 = vrcp.f32 %v4518_v57 }
 0x3af   : > { %vm1648_vm1 = vweird.f32 %v3940_v53  ;;  %vm4011_vm7 = vcmp.eq.f32.partialorder %v1651_v37, 8.507059e+37  ;;  %v1654_v55 = vor.u32 1.1754944e-38, %v1653_v11  ;;  %v1673_v29 = vmul.f32 %v4003_v14, %v4510_v17  ;;  %v4529_v37 = vld [vmem:[#allocation43_spill] sm:$0xff] }
 0x3b0   : > { %vm1677_vm10 = vweird.f32 %v4510_v17  ;;  %v4018_v10 = vpop.eup %2570  ;;  %v1646_v35 = vadd.f32 %v3940_v53, %v1645_v62  ;;  %v1660_v24 = vmul.f32 %v3970_v4, %v1659_v50  ;;  %vm4030_vm6 = vcmp.eq.f32.partialorder %v1666_v6, 8.507059e+37  ;;  %v4532_v62 = vld [vmem:[#allocation44_spill] sm:$0xff] }
 0x3b1   : > { %v1669_v48 = vor.u32 1.1754944e-38, %v1668_v27  ;;  %vm1692_vm4 = vweird.f32 %v4513_v13  ;;  %v4037_v41 = vsel %vm3949_vm3, %v1624_v60, %v1620_v63  ;;  %v1635_v26 = vsel %vm4024_vm5, %v3913_v49, %v1631_v19  ;;  %vm4055_vm3 = vmor %vm1647_vm11, %vm1648_vm1 }
 0x3b2   : > { %v1674_v34 = vsub.f32 1.0, %v1673_v29  ;;  %v1688_v30 = vmul.f32 %v4018_v10, %v4513_v13  ;;  %v1661_v36 = vadd.f32 %v3970_v4, %v1660_v24  ;;  %vm1663_vm9 = vweird.f32 %v3970_v4 }
 0x3b3   : > { %vm4046_vm13 = vcmp.eq.f32.partialorder %v1681_v43, 8.507059e+37  ;;  %v1684_v45 = vor.u32 1.1754944e-38, %v1683_v61  ;;  %v1696_v32 = vand.u32 2147483647, %v4513_v13  ;;  %v1698_v8 = vand.u32 2147483648, %v4513_v13  ;;  %vm4078_vm11 = vmor %vm1662_vm8, %vm1663_vm9 }
 0x3b4   : > { %v1675_v60 = vmul.f32 %v4003_v14, %v1674_v34  ;;  %v1689_v54 = vsub.f32 1.0, %v1688_v30  ;;  %2574 = vrcp.f32 %v4529_v37  ;;  %v4062_v11 = vpop.eup %2572  ;;  %v4066_v56 = vsel %vm3976_vm0, %v1639_v16, %v1635_v26 }
 0x3b5   : > { %v1650_v1 = vsel %vm4055_vm3, %v3940_v53, %v1646_v35  ;;  %vm1678_vm12 = vweird.f32 %v4003_v14  ;;  %vm1707_vm14 = vweird.f32 %v4518_v57  ;;  %v1711_v6 = vand.u32 2147483647, %v4518_v57  ;;  %v4539_v35 = vld [vmem:[#allocation45_spill] sm:$0xff] }
 0x3b6   : > { %v1676_v16 = vadd.f32 %v4003_v14, %v1675_v60  ;;  %v1690_v40 = vmul.f32 %v4018_v10, %v1689_v54  ;;  %v1703_v53 = vmul.f32 %v4062_v11, %v4518_v57  ;;  %v1713_v38 = vand.u32 2147483648, %v4518_v57  ;;  %vm4095_vm2 = vmor %vm1677_vm10, %vm1678_vm12 }
 0x3b7   : > { %v1665_v19 = vsel %vm4078_vm11, %v3970_v4, %v1661_v36  ;;  %vm1693_vm0 = vweird.f32 %v4018_v10  ;;  %v1728_v12 = vand.u32 2147483648, %v4529_v37  ;;  %2576 = vrcp.f32 %v4532_v62 }
 0x3b8   : > { %v1691_v63 = vadd.f32 %v4018_v10, %v1690_v40  ;;  %vm4100_vm8 = vcmp.eq.f32.partialorder %v1696_v32, 8.507059e+37  ;;  %v1699_v61 = vor.u32 1.1754944e-38, %v1698_v8  ;;  %v1704_v4 = vsub.f32 1.0, %v1703_v53  ;;  %vm4124_vm1 = vmor %vm1692_vm4, %vm1693_vm0  ;;  %v4542_v8 = vld [vmem:[#allocation46_spill] sm:$0xff] }
 0x3b9   : > { %v4106_v29 = vsel %vm4011_vm7, %v1654_v55, %v1650_v1  ;;  %v1680_v17 = vsel %vm4095_vm2, %v4003_v14, %v1676_v16  ;;  %vm4111_vm15 = vcmp.eq.f32.partialorder %v1711_v6, 8.507059e+37  ;;  %2578 = vrcp.f32 %v4539_v35 }
 0x3ba   : > { %v4116_v24 = vpop.eup %2574  ;;  %v4120_v26 = vsel %vm4030_vm6, %v1669_v48, %v1665_v19  ;;  %v1705_v14 = vmul.f32 %v4062_v11, %v1704_v4  ;;  %v1714_v55 = vor.u32 1.1754944e-38, %v1713_v38  ;;  %vm1722_vm7 = vweird.f32 %v4529_v37 }
 0x3bb   : > { %v1726_v34 = vand.u32 2147483647, %v4529_v37  ;;  %v1695_v30 = vsel %vm4124_vm1, %v4018_v10, %v1691_v63  ;;  %vm1708_vm10 = vweird.f32 %v4062_v11  ;;  %v1718_v13 = vmul.f32 %v4116_v24, %v4529_v37 }
 0x3bc   : > { %v1729_v47 = vor.u32 1.1754944e-38, %v1728_v12  ;;  %v4139_v48 = vsel %vm4046_vm13, %v1684_v45, %v1680_v17  ;;  %v1706_v36 = vadd.f32 %v4062_v11, %v1705_v14  ;;  %vm1737_vm5 = vweird.f32 %v4532_v62  ;;  %vm4153_vm6 = vmor %vm1707_vm14, %vm1708_vm10 }
 0x3bd   : > { %v1741_v32 = vand.u32 2147483647, %v4532_v62  ;;  %v2577_v49 = vpop.eup %2576  ;;  %v1719_v60 = vsub.f32 1.0, %v1718_v13  ;;  %v1743_v10 = vand.u32 2147483648, %v4532_v62  ;;  %v1756_v54 = vand.u32 2147483647, %v4539_v35 }
 0x3be   : > { %2580 = vrcp.f32 %v4542_v8  ;;  %v4149_v1 = vsel %vm4100_vm8, %v1699_v61, %v1695_v30  ;;  %vm4157_vm4 = vcmp.eq.f32.partialorder %v1726_v34, 8.507059e+37  ;;  %v1733_v6 = vmul.f32 %v2577_v49, %v4532_v62  ;;  %v4553_v13 = vld [vmem:[#allocation11_spill] sm:$0xff]  ;;  %v4566_v34 = vld [vmem:[#allocation4_spill] sm:$0xff] }
 0x3bf   : > { %vm1752_vm9 = vweird.f32 %v4539_v35  ;;  %v1758_v27 = vand.u32 2147483648, %v4539_v35  ;;  %v2579_v16 = vpop.eup %2578  ;;  %v1710_v40 = vsel %vm4153_vm6, %v4062_v11, %v1706_v36  ;;  %v1720_v57 = vmul.f32 %v4116_v24, %v1719_v60 }
 0x3c0   : > { %vm1723_vm13 = vweird.f32 %v4116_v24  ;;  %v1773_v53 = vand.u32 2147483648, %v4542_v8  ;;  %v1734_v38 = vsub.f32 1.0, %v1733_v6  ;;  %vm4170_vm3 = vcmp.eq.f32.partialorder %v1741_v32, 8.507059e+37  ;;  %v4560_v6 = vld [vmem:[#allocation22_spill] sm:$0xff] }
 0x3c1   : > { %v1748_v12 = vmul.f32 %v2579_v16, %v4539_v35  ;;  %v1771_v43 = vand.u32 2147483647, %v4542_v8  ;;  %v1721_v63 = vadd.f32 %v4116_v24, %v1720_v57  ;;  %vm1738_vm12 = vweird.f32 %v2577_v49  ;;  %vm4188_vm0 = vmor %vm1722_vm7, %vm1723_vm13  ;;  %v4562_v57 = vld [vmem:[#allocation24_spill] sm:$0xff] }
 0x3c2   : > { %v1744_v50 = vor.u32 1.1754944e-38, %v1743_v10  ;;  %vm4177_vm14 = vcmp.eq.f32.partialorder %v1756_v54, 8.507059e+37  ;;  %v1715_v61 = vsel %vm4111_vm15, %v1714_v55, %v1710_v40  ;;  %v1735_v4 = vmul.f32 %v2577_v49, %v1734_v38  ;;  %v4554_v55 = vld [vmem:[#allocation12_spill] sm:$0xff]  ;;  %vm4207_vm15 = vmor %vm1737_vm5, %vm1738_vm12 }
 0x3c3   : > { %v1749_v17 = vsub.f32 1.0, %v1748_v12  ;;  %v1759_v7 = vor.u32 1.1754944e-38, %v1758_v27  ;;  %vm1767_vm11 = vweird.f32 %v4542_v8  ;;  %vm1753_vm2 = vweird.f32 %v2579_v16  ;;  %v4561_v27 = vld [vmem:[#allocation23_spill] sm:$0xff] }
 0x3c4   : > { %v2581_v14 = vpop.eup %2580  ;;  %v1774_v30 = vor.u32 1.1754944e-38, %v1773_v53  ;;  %v1777_v2 = vmul.f32 %v3474_v28, %v4553_v13  ;;  %v1778_v36 = vmul.f32 %v3515_v21, %v4554_v55  ;;  %v1725_v32 = vsel %vm4188_vm0, %v4116_v24, %v1721_v63  ;;  %v4559_v21 = vld [vmem:[#allocation13_spill] sm:$0xff]  ;;  %vm1754_vm1 = vmor %vm1752_vm9, %vm1753_vm2  ;;  %v4575_v28 = vld [vmem:[#allocation15_spill] sm:$0xff] }
 0x3c5   : > { %v1736_v60 = vadd.f32 %v2577_v49, %v1735_v4  ;;  %v1750_v10 = vmul.f32 %v2579_v16, %v1749_v17  ;;  %v1763_v37 = vmul.f32 %v2581_v14, %v4542_v8  ;;  %vm4200_vm8 = vcmp.eq.f32.partialorder %v1771_v43, 8.507059e+37  ;;  %v4563_v43 = vld [vmem:[#allocation25_spill] sm:$0xff] }
 0x3c6   : > { %v1779_v0 = vmul.f32 %v3520_v20, %v4559_v21  ;;  %v1780_v24 = vmul.f32 %v3565_v51, %v4560_v6  ;;  %v1781_v40 = vmul.f32 %v3588_v5, %v4561_v27  ;;  %v1782_v53 = vmul.f32 %v3616_v33, %v4562_v57  ;;  %v4564_v51 = vld [vmem:[#allocation26_spill] sm:$0xff]  ;;  %v4565_v33 = vld [vmem:[#allocation3_spill] sm:$0xff] }
 0x3c7   : > { %v1740_v62 = vsel %vm4207_vm15, %v2577_v49, %v1736_v60  ;;  %v1751_v38 = vadd.f32 %v2579_v16, %v1750_v10  ;;  %v1764_v12 = vsub.f32 1.0, %v1763_v37  ;;  %v1783_v63 = vmul.f32 %v3621_v52, %v4563_v43  ;;  %v4567_v52 = vld [vmem:[#allocation5_spill] sm:$0xff]  ;;  %v4570_v60 = vld [vmem:[#allocation8_spill] sm:$0xff]  ;;  %v4572_v37 = vld [vmem:[#allocation10_spill] sm:$0xff] }
 0x3c8   : > { %v1730_v20 = vsel %vm4157_vm4, %v1729_v47, %v1725_v32  ;;  %vm1768_vm7 = vweird.f32 %v2581_v14  ;;  %v1784_v5 = vmul.f32 %v3646_v31, %v4564_v51  ;;  %v1785_v4 = vmul.f32 %v3669_v46, %v4565_v33  ;;  %v4568_v47 = vld [vmem:[#allocation6_spill] sm:$0xff]  ;;  %v4569_v32 = vld [vmem:[#allocation7_spill] sm:$0xff]  ;;  %v4571_v10 = vld [vmem:[#allocation9_spill] sm:$0xff] }
 0x3c9   : > { %v1755_v49 = vsel %vm1754_vm1, %v2579_v16, %v1751_v38  ;;  %v1765_v17 = vmul.f32 %v2581_v14, %v1764_v12  ;;  %v1786_v13 = vmul.f32 %v3674_v18, %v4566_v34  ;;  %v1787_v45 = vmul.f32 %v3696_v39, %v4567_v52  ;;  %vm1769_vm10 = vmor %vm1767_vm11, %vm1768_vm7  ;;  %v4578_v6 = vld [vmem:[#allocation18_spill] sm:$0xff]  ;;  %v4579_v27 = vld [vmem:[#allocation19_spill] sm:$0xff] }
 0x3ca   : > { %v1745_v35 = vsel %vm4170_vm3, %v1744_v50, %v1740_v62  ;;  %v1788_v55 = vmul.f32 %v3769_v9, %v4568_v47  ;;  %v1789_v31 = vmul.f32 %v3776_v58, %v4569_v32  ;;  %v1790_v46 = vmul.f32 %v3795_v3, %v4570_v60  ;;  %v4573_v9 = vld [vmem:[#allocation27_spill] sm:$0xff]  ;;  %v4574_v50 = vld [vmem:[#allocation14_spill] sm:$0xff]  ;;  %v4581_v12 = vld [vmem:[#allocation21_spill] sm:$0xff] }
 0x3cb   : > { %v1760_v16 = vsel %vm4177_vm14, %v1759_v7, %v1755_v49  ;;  %v1766_v18 = vadd.f32 %v2581_v14, %v1765_v17  ;;  %v1791_v39 = vmul.f32 %v3818_v23, %v4571_v10  ;;  %v1792_v19 = vmul.f32 %v3869_v22, %v4572_v37  ;;  %v4576_v7 = vld [vmem:[#allocation16_spill] sm:$0xff]  ;;  %v4577_v22 = vld [vmem:[#allocation17_spill] sm:$0xff] }
 0x3cc   : > { %v1793_v58 = vmul.f32 %v3884_v15, %v4573_v9  ;;  %v1801_v3 = vmul.f32 %v4120_v26, %v4574_v50  ;;  %v1802_v11 = vmul.f32 %v4139_v48, %v4575_v28  ;;  %v1803_v21 = vmul.f32 %v4149_v1, %v4576_v7  ;;  %v4580_v48 = vld [vmem:[#allocation20_spill] sm:$0xff]  ;;  %v4583_v17 = vld [vmem:[#allocation29_spill] sm:$0xff] }
 0x3cd   : > { %v1770_v23 = vsel %vm1769_vm10, %v2581_v14, %v1766_v18  ;;  %v1804_v8 = vmul.f32 %v1715_v61, %v4577_v22  ;;  %v1805_v15 = vmul.f32 %v1730_v20, %v4578_v6  ;;  %v1806_v57 = vmul.f32 %v1745_v35, %v4579_v27  ;;  %v4582_v49 = vld [vmem:[#allocation28_spill] sm:$0xff]  ;;  %v4587_v34 = vld [vmem:[#allocation33_spill] sm:$0xff] }
 0x3ce   : > { %v1775_v26 = vsel %vm4200_vm8, %v1774_v30, %v1770_v23  ;;  %v1807_v62 = vmul.f32 %v1760_v16, %v4580_v48  ;;  %v2304_v1 = vpack.c.bf16 %v1778_v36, %v1777_v2  ;;  %v2309_v38 = vpack.c.bf16 %v1780_v24, %v1779_v0  ;;  %v4584_v36 = vld [vmem:[#allocation30_spill] sm:$0xff]  ;;  %v4585_v24 = vld [vmem:[#allocation31_spill] sm:$0xff] }
 0x3cf   : > { %v1808_v43 = vmul.f32 %v1775_v26, %v4581_v12  ;;  %v2314_v51 = vpack.c.bf16 %v1782_v53, %v1781_v40  ;;  %v2319_v33 = vpack.c.bf16 %v1784_v5, %v1783_v63  ;;  %v2324_v14 = vpack.c.bf16 %v1786_v13, %v1785_v4  ;;  %v4586_v53 = vld [vmem:[#allocation32_spill] sm:$0xff]  ;;  %v4588_v13 = vld [vmem:[#allocation34_spill] sm:$0xff] }
 0x3d0   : > { %v1794_v61 = vmul.f32 %v3927_v42, %v4582_v49  ;;  %2305 = vst [vmem:[%s4265_s29] sm:$0xff] %v2304_v1   ;;  %v2329_v20 = vpack.c.bf16 %v1788_v55, %v1787_v45  ;;  %v2334_v54 = vpack.c.bf16 %v1790_v46, %v1789_v31  ;;  %v2339_v30 = vpack.c.bf16 %v1792_v19, %v1791_v39 }
 0x3d1   : > { %v1795_v2 = vmul.f32 %v3944_v59, %v4583_v17  ;;  %v1796_v0 = vmul.f32 %v3974_v44, %v4584_v36  ;;  %v1797_v40 = vmul.f32 %v3990_v25, %v4585_v24  ;;  %2411 = vst [vmem:[%s4265_s29 + $0x8] sm:$0xff] %v2309_v38   ;;  %v2364_v42 = vpack.c.bf16 %v1802_v11, %v1801_v3 }
 0x3d2   : > { %v1798_v63 = vmul.f32 %v4037_v41, %v4586_v53  ;;  %2412 = vst [vmem:[%s4265_s29 + $0x10] sm:$0xff] %v2314_v51   ;;  %v2369_v5 = vpack.c.bf16 %v1804_v8, %v1803_v21  ;;  %v2374_v4 = vpack.c.bf16 %v1806_v57, %v1805_v15  ;;  %v2379_v59 = vpack.c.bf16 %v1808_v43, %v1807_v62 }
 0x3d3   : > { %v1799_v44 = vmul.f32 %v4066_v56, %v4587_v34  ;;  %v1800_v25 = vmul.f32 %v4106_v29, %v4588_v13  ;;  %2413 = vst [vmem:[%s4265_s29 + $0x18] sm:$0xff] %v2319_v33   ;;  %v2344_v41 = vpack.c.bf16 %v1794_v61, %v1793_v58  ;;  %v2349_v52 = vpack.c.bf16 %v1796_v0, %v1795_v2 }
 0x3d4   : > { %2414 = vst [vmem:[%s4265_s29 + $0x20] sm:$0xff] %v2324_v14   ;;  %v2354_v45 = vpack.c.bf16 %v1798_v63, %v1797_v40 }
 0x3d5   : > { %2415 = vst [vmem:[%s4265_s29 + $0x28] sm:$0xff] %v2329_v20   ;;  %v2359_v35 = vpack.c.bf16 %v1800_v25, %v1799_v44 }
 0x3d6   : > { %2416 = vst [vmem:[%s4265_s29 + $0x30] sm:$0xff] %v2334_v54  }
 0x3d7   : > { %2417 = vst [vmem:[%s4265_s29 + $0x38] sm:$0xff] %v2339_v30  }
 0x3d8   : > { %2418 = vst [vmem:[%s4265_s29 + $0x40] sm:$0xff] %v2344_v41  }
 0x3d9   : > { %2419 = vst [vmem:[%s4265_s29 + $0x48] sm:$0xff] %v2349_v52  }
 0x3da   : > { %2420 = vst [vmem:[%s4265_s29 + $0x50] sm:$0xff] %v2354_v45  }
 0x3db   : > { %2421 = vst [vmem:[%s4265_s29 + $0x58] sm:$0xff] %v2359_v35  }
 0x3dc   : > { %2422 = vst [vmem:[%s4265_s29 + $0x60] sm:$0xff] %v2364_v42  }
 0x3dd   : > { %2423 = vst [vmem:[%s4265_s29 + $0x68] sm:$0xff] %v2369_v5  }
 0x3de   : > { %2424 = vst [vmem:[%s4265_s29 + $0x70] sm:$0xff] %v2374_v4  }
 0x3df   : > { %2425 = vst [vmem:[%s4265_s29 + $0x78] sm:$0xff] %v2379_v59  }
 0x3e0 PF: > { %s14_s17 = sadd.s32 1, %s2604_s17   ;;  %s4589_s15 = smov %s2600_s16 }
 0x3e1   : > { %p11_p5 = scmp.ge.s32.totalorder %s14_s17, 4   ;;  %s4590_s16 = smov %s4592_s18 }
 0x3e3   :  { %13 = sbr.rel (!%p11_p5) target bundleno = 2 (0x2), region = 84 }

</bundles_post_ra>
